<compile_context>
chip_gen: v5e
topology: v5e:2x2
jax: 0.10.0
libtpu: 0.0.40
codegen_flags: <defaults>
</compile_context>

<pallas_src>
import functools

import numpy as np
import jax
import jax.numpy as jnp
from jax import lax
from jax.experimental import pallas as pl
from jax.experimental.pallas import tpu as pltpu

Z_SIZE = 64          # z_size (test uses 128; kept small per instructions)
BN_EPS = 1e-5


# ----------------------------------------------------------------------------
# Kernel 1: layer 0.  ConvTranspose2d(z, 512, 4, stride=1) on a 1x1 input is a
# plain matmul (15/16 taps of the conv formulation multiply zeros).
# BN(eval) scale pre-folded into W; shift + ReLU fused into the epilogue.
# ----------------------------------------------------------------------------
def _fc_relu_kernel(z_ref, w_ref, shift_ref, o_ref):
    acc = jnp.dot(z_ref[...], w_ref[...], preferred_element_type=jnp.float32)
    o_ref[...] = jnp.maximum(acc + shift_ref[...], 0.0).astype(o_ref.dtype)


def fc_relu_layer(z_bf16, w_fc, shift_fc):
    n = z_bf16.shape[0]
    cols = w_fc.shape[1]                              # 4*4*512
    out = pl.pallas_call(
        _fc_relu_kernel,
        out_shape=jax.ShapeDtypeStruct((n, cols), jnp.bfloat16),
        in_specs=[pl.BlockSpec(memory_space=pltpu.MemorySpace.VMEM)] * 3,
        out_specs=pl.BlockSpec(memory_space=pltpu.MemorySpace.VMEM),
    )(z_bf16, w_fc, shift_fc)
    return out.reshape(n, 4, 4, 512)


# ----------------------------------------------------------------------------
# Kernel 2: stride-2 ConvTranspose2d(K=4, pad=1) + BN(eval) + ReLU via
# sub-pixel phase decomposition.  For output phase (rh, rw) and tap (dh, dw):
#   out[n, 2m+rh, 2p+rw, :] += xpad[n, m+rh+dh, p+rw+dw, :] @ W[:, :, 3-rh-2dh, 3-rw-2dw]
# where xpad is the input padded by 1.  Each phase is 4 MXU matmuls over the
# un-dilated input; phases are interleaved into the 2x grid by the wrapper.
# ----------------------------------------------------------------------------
def _deconv2x_phase_kernel(x_ref, w_ref, shift_ref, o_ref, *, H, W):
    cin = x_ref.shape[-1]
    shift = shift_ref[...]                            # (1, Cout) f32
    for ph in range(4):                               # phase = (rh, rw)
        rh, rw = ph // 2, ph % 2
        acc = None
        for t in range(4):                            # 2x2 taps of this phase
            dh, dw = t // 2, t % 2
            patch = x_ref[:, rh + dh:rh + dh + H, rw + dw:rw + dw + W, :]
            patch = patch.reshape(H * W, cin)
            part = jnp.dot(patch, w_ref[ph, t], preferred_element_type=jnp.float32)
            acc = part if acc is None else acc + part
        y = jnp.maximum(acc + shift, 0.0)
        o_ref[ph] = y.astype(o_ref.dtype)


def deconv2x_relu_layer(x, w_phase, shift):
    n, h, w_, cin = x.shape
    cout = w_phase.shape[-1]
    xp = jnp.pad(x, ((0, 0), (1, 1), (1, 1), (0, 0)))
    kernel = functools.partial(_deconv2x_phase_kernel, H=h, W=w_)
    out = pl.pallas_call(
        kernel,
        out_shape=jax.ShapeDtypeStruct((4, n * h * w_, cout), jnp.bfloat16),
        grid=(n,),
        in_specs=[
            pl.BlockSpec((1, h + 2, w_ + 2, cin), lambda i: (i, 0, 0, 0)),
            pl.BlockSpec((4, 4, cin, cout), lambda i: (0, 0, 0, 0)),
            pl.BlockSpec((1, cout), lambda i: (0, 0)),
        ],
        out_specs=pl.BlockSpec((4, h * w_, cout), lambda i: (0, i, 0)),
        compiler_params=pltpu.CompilerParams(dimension_semantics=("parallel",)),
    )(xp, w_phase, shift.reshape(1, cout))
    # Interleave the 4 phases into the 2x-upsampled NHWC grid (pure layout glue).
    out = out.reshape(2, 2, n, h, w_, cout).transpose(2, 3, 0, 4, 1, 5)
    return out.reshape(n, 2 * h, 2 * w_, cout)


# ----------------------------------------------------------------------------
# Kernel 3: final ConvTranspose2d(64, 3, 3, stride=1, pad=1) + Tanh + eval-mode
# post-processing.  Stride-1 deconv == stride-1 conv with flipped kernel and
# pad=1.  Cout padded 3 -> 128 so output stores are lane-dense; output rows
# processed in chunks so the f32 accumulator stays in vregs.
# ----------------------------------------------------------------------------
def _conv3_tanh_kernel(x_ref, w_ref, shift_ref, o_ref, *, H, W, RC):
    cin = x_ref.shape[-1]
    shift = shift_ref[...]                            # (1, 128) f32
    for c in range(H // RC):
        r0 = c * RC
        acc = None
        for kh in range(3):
            for kw in range(3):
                patch = x_ref[:, r0 + kh:r0 + kh + RC, kw:kw + W, :].reshape(RC * W, cin)
                part = jnp.dot(patch, w_ref[kh, kw], preferred_element_type=jnp.float32)
                acc = part if acc is None else acc + part
        y = jnp.tanh(acc + shift)
        y = 255.0 * (jnp.clip(y, -1.0, 1.0) * 0.5 + 0.5)   # eval-mode post-processing
        o_ref[r0 * W:(r0 + RC) * W, :] = y


def conv3_tanh_layer(x, w_conv, shift_pad):
    n, h, w_, cin = x.shape                           # (N, 32, 32, 64)
    cpad = w_conv.shape[-1]                           # 128 (lane-dense padded Cout)
    xp = jnp.pad(x, ((0, 0), (1, 1), (1, 1), (0, 0)))
    kernel = functools.partial(_conv3_tanh_kernel, H=h, W=w_, RC=8)
    out = pl.pallas_call(
        kernel,
        out_shape=jax.ShapeDtypeStruct((n * h * w_, cpad), jnp.float32),
        grid=(n,),
        in_specs=[
            pl.BlockSpec((1, h + 2, w_ + 2, cin), lambda i: (i, 0, 0, 0)),
            pl.BlockSpec((3, 3, cin, cpad), lambda i: (0, 0, 0, 0)),
            pl.BlockSpec((1, cpad), lambda i: (0, 0)),
        ],
        out_specs=pl.BlockSpec((h * w_, cpad), lambda i: (i, 0)),
        compiler_params=pltpu.CompilerParams(dimension_semantics=("parallel",)),
    )(xp, w_conv, shift_pad)
    return out.reshape(n, h, w_, cpad)[..., :3]       # drop lane padding


# ----------------------------------------------------------------------------
# Parameters.  BatchNorm uses PyTorch defaults (gamma=1, beta=0, mean=0, var=1)
# in eval mode; its scale is folded into the (bf16) conv weights, its shift
# (plus the conv bias) into a per-channel f32 shift.
# ----------------------------------------------------------------------------
def init_params(key, z_size=Z_SIZE):
    layer_defs = [
        # (cin,  cout, K, stride, pad, has_bn)
        (z_size, 512, 4, 1, 0, True),
        (512,    256, 4, 2, 1, True),
        (256,    128, 4, 2, 1, True),
        (128,     64, 4, 2, 1, True),
        (64,       3, 3, 1, 1, False),
    ]
    params = []
    for (cin, cout, k, s, p, has_bn) in layer_defs:
        key, kw_, kb_ = jax.random.split(key, 3)
        fan = cin * k * k
        w = jax.random.normal(kw_, (cin, cout, k, k), jnp.float32) / jnp.sqrt(fan)
        b = 0.1 * jax.random.normal(kb_, (cout,), jnp.float32)
        if has_bn:
            gamma = jnp.ones((cout,), jnp.float32)
            beta = jnp.zeros((cout,), jnp.float32)
            rmean = jnp.zeros((cout,), jnp.float32)
            rvar = jnp.ones((cout,), jnp.float32)
            s_bn = gamma / jnp.sqrt(rvar + BN_EPS)
            shift = beta + s_bn * (b - rmean)
        else:
            s_bn = jnp.ones((cout,), jnp.float32)
            shift = b
        w_folded = (w * s_bn[None, :, None, None]).astype(jnp.bfloat16)
        params.append(dict(w_bf16=w_folded, shift=shift.astype(jnp.float32),
                           K=k, stride=s, padding=p))
    return params


def _prep_fc_weights(w_deconv, shift):
    # (z, 512, 4, 4) -> (z, 4*4*512); shift broadcast to the same column layout.
    z, co, k, _ = w_deconv.shape
    w_fc = jnp.transpose(w_deconv, (0, 2, 3, 1)).reshape(z, k * k * co)
    shift_fc = jnp.broadcast_to(shift, (k * k, co)).reshape(1, k * k * co)
    return w_fc, shift_fc


def _prep_phase_weights(w_deconv):
    # (Cin, Cout, 4, 4) -> (4 phases, 4 taps, Cin, Cout)
    w_t = jnp.transpose(w_deconv, (2, 3, 0, 1))       # [kh, kw, Cin, Cout]
    phases = []
    for rh in range(2):
        for rw in range(2):
            taps = []
            for dh in range(2):
                for dw in range(2):
                    taps.append(w_t[3 - rh - 2 * dh, 3 - rw - 2 * dw])
            phases.append(jnp.stack(taps))
    return jnp.stack(phases)


def _prep_final_weights(w_deconv, shift, cpad=128):
    # (64, 3, 3, 3) -> spatially flipped HWIO, Cout padded to `cpad` lanes.
    cin, cout, k, _ = w_deconv.shape
    wc = jnp.transpose(w_deconv[:, :, ::-1, ::-1], (2, 3, 0, 1))   # (3, 3, 64, 3)
    wc = jnp.pad(wc, ((0, 0), (0, 0), (0, 0), (0, cpad - cout)))
    shift_pad = jnp.pad(shift, (0, cpad - cout)).reshape(1, cpad)
    return wc, shift_pad


def prepare_kernel_params(params):
    p0, p1, p2, p3, p4 = params
    w_fc, shift_fc = _prep_fc_weights(p0["w_bf16"], p0["shift"])
    wc4, shift4 = _prep_final_weights(p4["w_bf16"], p4["shift"])
    return dict(
        w_fc=w_fc, shift_fc=shift_fc,
        wp1=_prep_phase_weights(p1["w_bf16"]), shift1=p1["shift"],
        wp2=_prep_phase_weights(p2["w_bf16"]), shift2=p2["shift"],
        wp3=_prep_phase_weights(p3["w_bf16"]), shift3=p3["shift"],
        wc4=wc4, shift4=shift4,
    )


# ----------------------------------------------------------------------------
# Forward pass (eval-mode semantics).
# ----------------------------------------------------------------------------
def dummy_generator_float(z, kp):
    """Returns float NHWC image in [0, 255] (pre-uint8-cast)."""
    x = fc_relu_layer(z.astype(jnp.bfloat16), kp["w_fc"], kp["shift_fc"])  # (N,4,4,512)
    x = deconv2x_relu_layer(x, kp["wp1"], kp["shift1"])                    # (N,8,8,256)
    x = deconv2x_relu_layer(x, kp["wp2"], kp["shift2"])                    # (N,16,16,128)
    x = deconv2x_relu_layer(x, kp["wp3"], kp["shift3"])                    # (N,32,32,64)
    x = conv3_tanh_layer(x, kp["wc4"], kp["shift4"])                       # (N,32,32,3)
    return x


def dummy_generator_forward(z, kp):
    """Full eval-mode forward: NCHW uint8 images, like the PyTorch module."""
    x = dummy_generator_float(z, kp)
    return jnp.transpose(x, (0, 3, 1, 2)).astype(jnp.uint8)


# ----------------------------------------------------------------------------
# Pure-JAX reference.  Uses the *same* bf16-folded weights and bf16 inter-layer
# activations (f32 accumulation via HIGHEST precision) so only reassociation
# differs from the kernels.
# ----------------------------------------------------------------------------
def _ref_forward_float(z, params):
    n = z.shape[0]
    x = z.astype(jnp.bfloat16).astype(jnp.float32).reshape(n, 1, 1, z.shape[1])
    for i, p in enumerate(params):
        w = p["w_bf16"].astype(jnp.float32)           # (Cin, Cout, K, K), scale folded
        k = p["K"]
        pad = k - 1 - p["padding"]
        w_conv = jnp.transpose(w[:, :, ::-1, ::-1], (2, 3, 0, 1))   # HWIO
        y = lax.conv_general_dilated(
            x, w_conv, window_strides=(1, 1),
            padding=[(pad, pad), (pad, pad)],
            lhs_dilation=(p["stride"], p["stride"]),
            dimension_numbers=("NHWC", "HWIO", "NHWC"),
            precision=lax.Precision.HIGHEST)
        y = y + p["shift"]
        if i < 4:
            y = jnp.maximum(y, 0.0)
            y = y.astype(jnp.bfloat16).astype(jnp.float32)   # mimic bf16 activations
        else:
            y = jnp.tanh(y)
            y = 255.0 * (jnp.clip(y, -1.0, 1.0) * 0.5 + 0.5)
        x = y
    return x


if __name__ == "__main__":
    key = jax.random.PRNGKey(0)
    kparam, kz = jax.random.split(key)
    params = init_params(kparam, Z_SIZE)
    kp = prepare_kernel_params(params)
    z = jax.random.normal(kz, (2, Z_SIZE), jnp.float32)    # batch=2 latents

    out_f = jax.block_until_ready(dummy_generator_float(z, kp))
    assert out_f.shape == (2, 32, 32, 3) and out_f.dtype == jnp.float32, out_f.shape

    ref_f = jax.block_until_ready(_ref_forward_float(z, params))
    np.testing.assert_allclose(np.asarray(out_f), np.asarray(ref_f),
                               rtol=5e-3, atol=0.5)

    img = jax.block_until_ready(dummy_generator_forward(z, kp))
    assert img.shape == (2, 3, 32, 32) and img.dtype == jnp.uint8

    print("KERNEL_OK")
</pallas_src>

<mosaic_0001>
module attributes {stable_mosaic.version = 11 : i64} {
  func.func @_fc_relu_kernel(%arg0: memref<2x64xbf16, #tpu.memory_space<vmem>>, %arg1: memref<64x8192xbf16, #tpu.memory_space<vmem>>, %arg2: memref<1x8192xf32, #tpu.memory_space<vmem>>, %arg3: memref<2x8192xbf16, #tpu.memory_space<vmem>>) attributes {dimension_semantics = [], scalar_prefetch = 0 : i64, scratch_operands = 0 : i64, tpu.core_type = #tpu.core_type<tc>} {
    %c0 = arith.constant 0 : index
    %c0_0 = arith.constant 0 : index
    %0 = vector.load %arg0[%c0, %c0_0] : memref<2x64xbf16, #tpu.memory_space<vmem>>, vector<2x64xbf16>
    %c0_1 = arith.constant 0 : index
    %c0_2 = arith.constant 0 : index
    %1 = vector.load %arg1[%c0_1, %c0_2] : memref<64x8192xbf16, #tpu.memory_space<vmem>>, vector<64x8192xbf16>
    %cst = arith.constant dense<0.000000e+00> : vector<2x8192xf32>
    %2 = tpu.matmul %0, %1, %cst {dimension_numbers = #tpu.dot_dimension_numbers<[1], [0], [0], [1], [0, 0, 1, 1], [], []>} : vector<2x64xbf16>, vector<64x8192xbf16>, vector<2x8192xf32> -> vector<2x8192xf32>
    %c0_3 = arith.constant 0 : index
    %c0_4 = arith.constant 0 : index
    %3 = vector.load %arg2[%c0_3, %c0_4] : memref<1x8192xf32, #tpu.memory_space<vmem>>, vector<1x8192xf32>
    %4 = vector.broadcast %3 : vector<1x8192xf32> to vector<2x8192xf32>
    %5 = arith.addf %2, %4 : vector<2x8192xf32>
    %cst_5 = arith.constant 0.000000e+00 : f32
    %6 = vector.broadcast %cst_5 : f32 to vector<2x8192xf32>
    %7 = arith.maximumf %5, %6 : vector<2x8192xf32>
    %8 = arith.truncf %7 : vector<2x8192xf32> to vector<2x8192xbf16>
    %c0_6 = arith.constant 0 : index
    %c0_7 = arith.constant 0 : index
    %9 = vector.load %arg3[%c0_6, %c0_7] : memref<2x8192xbf16, #tpu.memory_space<vmem>>, vector<2x8192xbf16>
    tpu.vector_store %arg3[%c0_6, %c0_7], %8 {strides = array<i32>} : memref<2x8192xbf16, #tpu.memory_space<vmem>>, vector<2x8192xbf16>,
    return
  }
}

</mosaic_0001>

<bundles_post_ra>
// kernel: tpu_custom_call.1
= control target key start
LH: loop header
LB: loop body
LE: loop exit
PB: predicated region body
PF: predicated region fallthrough
CT: control target
= control target key end

     0   :  { %8 = vsyncpa [#allocation3], 0  ;;  %s4690_s0 = inlined_call_operand.hbm [shape: bf16[2,64], index: 0, kind: input, shape index: {}]   ;;  %s4691_s1 = inlined_call_operand.hbm [shape: bf16[64,8192], index: 1, kind: input, shape index: {}]   ;;  %s4692_s2 = inlined_call_operand.hbm [shape: f32[1,8192], index: 2, kind: input, shape index: {}]   ;;  %s4693_s3 = inlined_call_operand.hbm [shape: bf16[2,8192], index: 3, kind: output, shape index: {}]  }
   0x1   :  { %9 = vsyncpa [#allocation6], 0  ;;  %s26_s14 = sshll.u32 %s4691_s1, 4  ;;  %s27_s14 = int_to_ptr.hbm [resolvable:$true] %s26_s14 }
   0x2   :  { %10 = vsyncpa [#allocation4], 0  ;;  %s4375_s15 = smov [#allocation5]   ;;  %s16_s19 = sshll.u32 %s4690_s0, 4  ;;  %s17_s19 = int_to_ptr.hbm [resolvable:$true] %s16_s19 }
   0x3   :  { %s28_s16 = sshll.u32 %s4375_s15, 4  ;;  %s4376_s20 = smov 4096   ;;  %s29_s16 = int_to_ptr.vmem [resolvable:$true] %s28_s16 }
   0x4   :  { %s4377_s21 = smov 256   ;;  %s4378_s22 = smov [#allocation2]  }
   0x5   :  { %34 = dma.hbm_to_vmem [thread:$0]  %s27_s14, 32768, %s29_s16, [#allocation6], %s4376_s20, %s4376_s20, %s4377_s21  }
   0x6   :  { %s18_s23 = sshll.u32 %s4378_s22, 4  ;;  %s40_s26 = sshll.u32 %s4692_s2, 4  ;;  %s19_s23 = int_to_ptr.vmem [resolvable:$true] %s18_s23  ;;  %s41_s26 = int_to_ptr.hbm [resolvable:$true] %s40_s26 }
   0x7   :  { %21 = dma.hbm_to_vmem [thread:$0]  %s17_s19, 16, %s19_s23, [#allocation3]  }
   0x8   :  { %s4379_s1 = smov [#allocation7]  }
   0x9   :  { %s42_s27 = sshll.u32 %s4379_s1, 4  ;;  %s43_s27 = int_to_ptr.vmem [resolvable:$true] %s42_s27 }
   0xa   :  { %45 = dma.hbm_to_vmem [thread:$0]  %s41_s26, 1024, %s43_s27, [#allocation6]  }
   0xb   :  { %4369 = dma.done.wait [#allocation3], 16  }
   0xc   :  { %4370 = vsyncadd [#allocation3], 4294967280 }
   0xd   :  { %4371 = dma.done.wait [#allocation6], 33792  }
   0xe   :  { %4372 = vsyncadd [#allocation6], 4294933504  ;;  %v3691_v0 = vld [vmem:[#allocation5 + $0x600] sm:$0xf]  ;;  %v4201_v2 = vld [vmem:[#allocation5 + $0x604] sm:$0xf] }
   0xf   :  { %v4233_v1 = vld [vmem:[#allocation5 + $0x6fc] sm:$0xf0]  ;;  %v3693_v4 = vld [vmem:[#allocation5 + $0x700] sm:$0xf0]  ;;  %v3699_v5 = vld [vmem:[#allocation5 + $0x608] sm:$0xf] }
  0x10   :  { %v3692_v3 = vor.u32 %v4233_v1, %v3691_v0  ;;  %v4234_v6 = vld [vmem:[#allocation5 + $0x704] sm:$0xf0]  ;;  %v3696_v7 = vor.u32 %v4201_v2, %v3693_v4  ;;  %v4202_v9 = vld [vmem:[#allocation5 + $0x60c] sm:$0xf]  ;;  %v3435_v11 = vld [vmem:[#allocation5 + $0x400] sm:$0xf] }
  0x11   :  { %v3700_v8 = vor.u32 %v4234_v6, %v3699_v5  ;;  %v3701_v10 = vld [vmem:[#allocation5 + $0x708] sm:$0xf0]  ;;  %v4169_v13 = vld [vmem:[#allocation5 + $0x4fc] sm:$0xf0]  ;;  %v4137_v14 = vld [vmem:[#allocation5 + $0x404] sm:$0xf] }
  0x12   :  { %1748 = vmatpush.bf16.msra.mxu0 %v3692_v3  ;;  %v3704_v12 = vor.u32 %v4202_v9, %v3701_v10  ;;  %v3437_v15 = vld [vmem:[#allocation5 + $0x500] sm:$0xf0]  ;;  %1761 = vmatpush.bf16.msra.mxu1 %v3696_v7  ;;  %v3436_v16 = vor.u32 %v4169_v13, %v3435_v11  ;;  %v3443_v18 = vld [vmem:[#allocation5 + $0x408] sm:$0xf]  ;;  %v4138_v20 = vld [vmem:[#allocation5 + $0x40c] sm:$0xf] }
  0x13   :  { %1774 = vmatpush.bf16.msra.mxu2 %v3700_v8  ;;  %v3440_v17 = vor.u32 %v4137_v14, %v3437_v15  ;;  %v4170_v19 = vld [vmem:[#allocation5 + $0x504] sm:$0xf0]  ;;  %v3445_v22 = vld [vmem:[#allocation5 + $0x508] sm:$0xf0]  ;;  %v3179_v23 = vld [vmem:[#allocation5 + $0x200] sm:$0xf] }
  0x14   :  { %1787 = vmatpush.bf16.msra.mxu3 %v3704_v12  ;;  %v3444_v21 = vor.u32 %v4170_v19, %v3443_v18  ;;  %v4105_v24 = vld [vmem:[#allocation5 + $0x2fc] sm:$0xf0]  ;;  %v3448_v25 = vor.u32 %v4138_v20, %v3445_v22  ;;  %v4073_v26 = vld [vmem:[#allocation5 + $0x204] sm:$0xf]  ;;  %v3187_v28 = vld [vmem:[#allocation5 + $0x208] sm:$0xf] }
  0x15   :  { %v3181_v27 = vld [vmem:[#allocation5 + $0x300] sm:$0xf0]  ;;  %v3180_v29 = vor.u32 %v4105_v24, %v3179_v23  ;;  %v4106_v30 = vld [vmem:[#allocation5 + $0x304] sm:$0xf0]  ;;  %v4074_v31 = vld [vmem:[#allocation5 + $0x20c] sm:$0xf] }
  0x16   :  { %1749 = vmatpush.bf16.msra.mxu0 %v3436_v16  ;;  %v3189_v32 = vld [vmem:[#allocation5 + $0x308] sm:$0xf0]  ;;  %1762 = vmatpush.bf16.msra.mxu1 %v3440_v17  ;;  %v3184_v33 = vor.u32 %v4073_v26, %v3181_v27  ;;  %v3188_v34 = vor.u32 %v4106_v30, %v3187_v28  ;;  %v2923_v35 = vld [vmem:[#allocation5] sm:$0xf]  ;;  %v4009_v37 = vld [vmem:[#allocation5 + $0x4] sm:$0xf] }
  0x17   :  { %1775 = vmatpush.bf16.msra.mxu2 %v3444_v21  ;;  %v4041_v36 = vld [vmem:[#allocation5 + $0xfc] sm:$0xf0]  ;;  %v3192_v38 = vor.u32 %v4074_v31, %v3189_v32  ;;  %v2925_v39 = vld [vmem:[#allocation5 + $0x100] sm:$0xf0]  ;;  %v2931_v40 = vld [vmem:[#allocation5 + $0x8] sm:$0xf] }
  0x18   :  { %1788 = vmatpush.bf16.msra.mxu3 %v3448_v25  ;;  %v4042_v41 = vld [vmem:[#allocation5 + $0x104] sm:$0xf0]  ;;  %v4010_v42 = vld [vmem:[#allocation5 + $0xc] sm:$0xf]  ;;  %v2924_v44 = vor.u32 %v4041_v36, %v2923_v35  ;;  %v3715_v45 = vld [vmem:[#allocation5 + $0x618] sm:$0xf]  ;;  %v2928_v48 = vor.u32 %v4009_v37, %v2925_v39 }
  0x19   :  { %v2933_v43 = vld [vmem:[#allocation5 + $0x108] sm:$0xf0]  ;;  %v4236_v46 = vld [vmem:[#allocation5 + $0x714] sm:$0xf0]  ;;  %v4204_v47 = vld [vmem:[#allocation5 + $0x61c] sm:$0xf]  ;;  %v2932_v49 = vor.u32 %v4042_v41, %v2931_v40 }
  0x1a   :  { %1750 = vmatpush.bf16.msra.mxu0 %v3180_v29  ;;  %1763 = vmatpush.bf16.msra.mxu1 %v3184_v33  ;;  %vm1740_vm0 = vcmask 523264   ;;  %v3717_v50 = vld [vmem:[#allocation5 + $0x718] sm:$0xf0]  ;;  %v2936_v51 = vor.u32 %v4010_v42, %v2933_v43  ;;  %v3716_v52 = vor.u32 %v4236_v46, %v3715_v45  ;;  %v3707_v53 = vld [vmem:[#allocation5 + $0x610] sm:$0xf]  ;;  %vm2764_vm1 = vcmask 1042434  }
  0x1b   :  { %1776 = vmatpush.bf16.msra.mxu2 %v3188_v34  ;;  %v4235_v54 = vld [vmem:[#allocation5 + $0x70c] sm:$0xf0]  ;;  %v4203_v55 = vld [vmem:[#allocation5 + $0x614] sm:$0xf]  ;;  %v3720_v56 = vor.u32 %v4204_v47, %v3717_v50  ;;  %v3459_v58 = vld [vmem:[#allocation5 + $0x418] sm:$0xf] }
  0x1c   :  { %1789 = vmatpush.bf16.msra.mxu3 %v3192_v38  ;;  %v3709_v57 = vld [vmem:[#allocation5 + $0x710] sm:$0xf0]  ;;  %v4172_v59 = vld [vmem:[#allocation5 + $0x514] sm:$0xf0]  ;;  %v4410_v60 = vld [vmem:[#allocation2] sm:$0x1]  ;;  %v3708_v63 = vor.u32 %v4235_v54, %v3707_v53 }
  0x1d   :  { %v4140_v61 = vld [vmem:[#allocation5 + $0x41c] sm:$0xf]  ;;  %v3712_v0 = vor.u32 %v4203_v55, %v3709_v57  ;;  %v3460_v1 = vor.u32 %v4172_v59, %v3459_v58  ;;  %v3451_v2 = vld [vmem:[#allocation5 + $0x410] sm:$0xf]  ;;  %v4139_v4 = vld [vmem:[#allocation5 + $0x414] sm:$0xf] }
  0x1e   :  { %1751 = vmatpush.bf16.msra.mxu0 %v2924_v44  ;;  %v3461_v62 = vld [vmem:[#allocation5 + $0x518] sm:$0xf0]  ;;  %1764 = vmatpush.bf16.msra.mxu1 %v2928_v48  ;;  %v4171_v3 = vld [vmem:[#allocation5 + $0x50c] sm:$0xf0]  ;;  %v3453_v6 = vld [vmem:[#allocation5 + $0x510] sm:$0xf0] }
  0x1f   :  { %1777 = vmatpush.bf16.msra.mxu2 %v2932_v49  ;;  %v3464_v5 = vor.u32 %v4140_v61, %v3461_v62  ;;  %v3203_v7 = vld [vmem:[#allocation5 + $0x218] sm:$0xf]  ;;  %v4076_v9 = vld [vmem:[#allocation5 + $0x21c] sm:$0xf]  ;;  %v3452_v11 = vor.u32 %v4171_v3, %v3451_v2  ;;  %v3195_v12 = vld [vmem:[#allocation5 + $0x210] sm:$0xf]  ;;  %v3456_v13 = vor.u32 %v4139_v4, %v3453_v6 }
  0x20   :  { %1790 = vmatpush.bf16.msra.mxu3 %v2936_v51  ;;  %v4108_v8 = vld [vmem:[#allocation5 + $0x314] sm:$0xf0]  ;;  %v3205_v10 = vld [vmem:[#allocation5 + $0x318] sm:$0xf0]  ;;  %v4107_v15 = vld [vmem:[#allocation5 + $0x30c] sm:$0xf0] }
  0x21   :  { %3945 = vmatmul.msk.bf16.vlgmr.msra.gmra.mxu0 %vm1740_vm0, %v4410_v60  ;;  %3946 = vmatmul.msk.bf16.vlgmr.msra.gmra.mxu1 %vm1740_vm0, %v4410_v60  ;;  %v3204_v14 = vor.u32 %v4108_v8, %v3203_v7  ;;  %v4075_v16 = vld [vmem:[#allocation5 + $0x214] sm:$0xf]  ;;  %v3208_v18 = vor.u32 %v4076_v9, %v3205_v10  ;;  %v2947_v19 = vld [vmem:[#allocation5 + $0x18] sm:$0xf]  ;;  %v4012_v21 = vld [vmem:[#allocation5 + $0x1c] sm:$0xf]  ;;  %v3196_v25 = vor.u32 %v4107_v15, %v3195_v12 }
  0x22   :  { %3947 = vmatmul.msk.bf16.vlgmr.msra.gmra.mxu2 %vm1740_vm0, %v4410_v60  ;;  %1800 = vmatpush.bf16.msrb.mxu0 %v3708_v63  ;;  %v3197_v17 = vld [vmem:[#allocation5 + $0x310] sm:$0xf0]  ;;  %v4044_v20 = vld [vmem:[#allocation5 + $0x114] sm:$0xf0]  ;;  %v2949_v22 = vld [vmem:[#allocation5 + $0x118] sm:$0xf0] }
  0x23   :  { %1826 = vmatpush.bf16.msrb.mxu2 %v3716_v52  ;;  %3948 = vmatmul.msk.bf16.vlgmr.msra.gmra.mxu3 %vm1740_vm0, %v4410_v60  ;;  %v3731_v23 = vld [vmem:[#allocation5 + $0x628] sm:$0xf]  ;;  %v2939_v26 = vld [vmem:[#allocation5 + $0x10] sm:$0xf]  ;;  %v4206_v27 = vld [vmem:[#allocation5 + $0x62c] sm:$0xf]  ;;  %v3200_v29 = vor.u32 %v4075_v16, %v3197_v17  ;;  %v2948_v30 = vor.u32 %v4044_v20, %v2947_v19  ;;  %v2952_v34 = vor.u32 %v4012_v21, %v2949_v22 }
  0x24   :  { %1839 = vmatpush.bf16.msrb.mxu3 %v3720_v56  ;;  %1813 = vmatpush.bf16.msrb.mxu1 %v3712_v0  ;;  %v4238_v24 = vld [vmem:[#allocation5 + $0x724] sm:$0xf0]  ;;  %v3733_v28 = vld [vmem:[#allocation5 + $0x728] sm:$0xf0]  ;;  %v4043_v31 = vld [vmem:[#allocation5 + $0x10c] sm:$0xf0] }
  0x25   :  { %v4011_v32 = vld [vmem:[#allocation5 + $0x14] sm:$0xf]  ;;  %v3732_v35 = vor.u32 %v4238_v24, %v3731_v23  ;;  %v3723_v36 = vld [vmem:[#allocation5 + $0x620] sm:$0xf]  ;;  %v4205_v38 = vld [vmem:[#allocation5 + $0x624] sm:$0xf]  ;;  %v3736_v39 = vor.u32 %v4206_v27, %v3733_v28  ;;  %v2940_v43 = vor.u32 %v4043_v31, %v2939_v26 }
  0x26   :  { %1801 = vmatpush.bf16.msrb.mxu0 %v3452_v11  ;;  %v2941_v33 = vld [vmem:[#allocation5 + $0x110] sm:$0xf0]  ;;  %v4237_v37 = vld [vmem:[#allocation5 + $0x71c] sm:$0xf0]  ;;  %v3725_v40 = vld [vmem:[#allocation5 + $0x720] sm:$0xf0] }
  0x27   :  { %1827 = vmatpush.bf16.msrb.mxu2 %v3460_v1  ;;  %v3475_v41 = vld [vmem:[#allocation5 + $0x428] sm:$0xf]  ;;  %v2944_v44 = vor.u32 %v4011_v32, %v2941_v33  ;;  %v3724_v45 = vor.u32 %v4237_v37, %v3723_v36  ;;  %v4142_v46 = vld [vmem:[#allocation5 + $0x42c] sm:$0xf]  ;;  %v3728_v48 = vor.u32 %v4205_v38, %v3725_v40  ;;  %v3467_v50 = vld [vmem:[#allocation5 + $0x420] sm:$0xf] }
  0x28   :  { %1840 = vmatpush.bf16.msrb.mxu3 %v3464_v5  ;;  %1814 = vmatpush.bf16.msrb.mxu1 %v3456_v13  ;;  %v4174_v42 = vld [vmem:[#allocation5 + $0x524] sm:$0xf0]  ;;  %v3477_v47 = vld [vmem:[#allocation5 + $0x528] sm:$0xf0]  ;;  %v4173_v51 = vld [vmem:[#allocation5 + $0x51c] sm:$0xf0] }
  0x29   :  { %v3476_v49 = vor.u32 %v4174_v42, %v3475_v41  ;;  %v4141_v52 = vld [vmem:[#allocation5 + $0x424] sm:$0xf]  ;;  %v3219_v54 = vld [vmem:[#allocation5 + $0x228] sm:$0xf]  ;;  %v3480_v56 = vor.u32 %v4142_v46, %v3477_v47  ;;  %v3468_v57 = vor.u32 %v4173_v51, %v3467_v50  ;;  %v4078_v58 = vld [vmem:[#allocation5 + $0x22c] sm:$0xf] }
  0x2a   :  { %1802 = vmatpush.bf16.msrb.mxu0 %v3196_v25  ;;  %v3469_v53 = vld [vmem:[#allocation5 + $0x520] sm:$0xf0]  ;;  %v4110_v55 = vld [vmem:[#allocation5 + $0x324] sm:$0xf0]  ;;  %v3221_v59 = vld [vmem:[#allocation5 + $0x328] sm:$0xf0] }
  0x2b   :  { %1828 = vmatpush.bf16.msrb.mxu2 %v3204_v14  ;;  %v3472_v61 = vor.u32 %v4141_v52, %v3469_v53  ;;  %v3220_v62 = vor.u32 %v4110_v55, %v3219_v54  ;;  %v3211_v63 = vld [vmem:[#allocation5 + $0x220] sm:$0xf]  ;;  %v4077_v1 = vld [vmem:[#allocation5 + $0x224] sm:$0xf]  ;;  %v2963_v3 = vld [vmem:[#allocation5 + $0x28] sm:$0xf]  ;;  %v3224_v7 = vor.u32 %v4078_v58, %v3221_v59 }
  0x2c   :  { %1841 = vmatpush.bf16.msrb.mxu3 %v3208_v18  ;;  %1815 = vmatpush.bf16.msrb.mxu1 %v3200_v29  ;;  %v4109_v0 = vld [vmem:[#allocation5 + $0x31c] sm:$0xf0]  ;;  %v3213_v2 = vld [vmem:[#allocation5 + $0x320] sm:$0xf0]  ;;  %v4046_v4 = vld [vmem:[#allocation5 + $0x124] sm:$0xf0] }
  0x2d   :  { %v3747_v5 = vld [vmem:[#allocation5 + $0x638] sm:$0xf]  ;;  %v3212_v8 = vor.u32 %v4109_v0, %v3211_v63  ;;  %v4014_v9 = vld [vmem:[#allocation5 + $0x2c] sm:$0xf]  ;;  %v2955_v11 = vld [vmem:[#allocation5 + $0x20] sm:$0xf]  ;;  %v3216_v12 = vor.u32 %v4077_v1, %v3213_v2  ;;  %v2964_v13 = vor.u32 %v4046_v4, %v2963_v3 }
  0x2e   :  { %1803 = vmatpush.bf16.msrb.mxu0 %v2940_v43  ;;  %v4240_v6 = vld [vmem:[#allocation5 + $0x734] sm:$0xf0]  ;;  %v2965_v10 = vld [vmem:[#allocation5 + $0x128] sm:$0xf0]  ;;  %v4045_v14 = vld [vmem:[#allocation5 + $0x11c] sm:$0xf0] }
  0x2f   :  { %1829 = vmatpush.bf16.msrb.mxu2 %v2948_v30  ;;  %v4013_v15 = vld [vmem:[#allocation5 + $0x24] sm:$0xf]  ;;  %v3748_v17 = vor.u32 %v4240_v6, %v3747_v5  ;;  %v4208_v18 = vld [vmem:[#allocation5 + $0x63c] sm:$0xf]  ;;  %v3739_v20 = vld [vmem:[#allocation5 + $0x630] sm:$0xf]  ;;  %v2968_v24 = vor.u32 %v4014_v9, %v2965_v10  ;;  %v2956_v25 = vor.u32 %v4045_v14, %v2955_v11 }
  0x30   :  { %1842 = vmatpush.bf16.msrb.mxu3 %v2952_v34  ;;  %1816 = vmatpush.bf16.msrb.mxu1 %v2944_v44  ;;  %v2957_v16 = vld [vmem:[#allocation5 + $0x120] sm:$0xf0]  ;;  %v3749_v19 = vld [vmem:[#allocation5 + $0x738] sm:$0xf0]  ;;  %v4239_v21 = vld [vmem:[#allocation5 + $0x72c] sm:$0xf0] }
  0x31   :  { %3949 = vmatmul.msk.bf16.vlgmr.msrb.gmra.mxu0 %vm1740_vm0, %v4410_v60  ;;  %v4207_v22 = vld [vmem:[#allocation5 + $0x634] sm:$0xf]  ;;  %v3491_v26 = vld [vmem:[#allocation5 + $0x438] sm:$0xf]  ;;  %v2960_v28 = vor.u32 %v4013_v15, %v2957_v16  ;;  %v3752_v29 = vor.u32 %v4208_v18, %v3749_v19  ;;  %v3740_v30 = vor.u32 %v4239_v21, %v3739_v20  ;;  %v4144_v32 = vld [vmem:[#allocation5 + $0x43c] sm:$0xf] }
  0x32   :  { %1852 = vmatpush.bf16.msra.mxu0 %v3724_v45  ;;  %3951 = vmatmul.msk.bf16.vlgmr.msrb.gmra.mxu2 %vm1740_vm0, %v4410_v60  ;;  %v3741_v23 = vld [vmem:[#allocation5 + $0x730] sm:$0xf0]  ;;  %v4176_v27 = vld [vmem:[#allocation5 + $0x534] sm:$0xf0]  ;;  %v3493_v33 = vld [vmem:[#allocation5 + $0x538] sm:$0xf0] }
  0x33   :  { %1878 = vmatpush.bf16.msra.mxu2 %v3732_v35  ;;  %3950 = vmatmul.msk.bf16.vlgmr.msrb.gmra.mxu1 %vm1740_vm0, %v4410_v60  ;;  %v3744_v31 = vor.u32 %v4207_v22, %v3741_v23  ;;  %v3492_v34 = vor.u32 %v4176_v27, %v3491_v26  ;;  %v3483_v35 = vld [vmem:[#allocation5 + $0x430] sm:$0xf]  ;;  %v3496_v37 = vor.u32 %v4144_v32, %v3493_v33  ;;  %v4143_v38 = vld [vmem:[#allocation5 + $0x434] sm:$0xf]  ;;  %v3235_v40 = vld [vmem:[#allocation5 + $0x238] sm:$0xf] }
  0x34   :  { %1891 = vmatpush.bf16.msra.mxu3 %v3736_v39  ;;  %1865 = vmatpush.bf16.msra.mxu1 %v3728_v48  ;;  %v4175_v36 = vld [vmem:[#allocation5 + $0x52c] sm:$0xf0]  ;;  %v3485_v39 = vld [vmem:[#allocation5 + $0x530] sm:$0xf0]  ;;  %v4112_v41 = vld [vmem:[#allocation5 + $0x334] sm:$0xf0] }
  0x35   :  { %3952 = vmatmul.msk.bf16.vlgmr.msrb.gmra.mxu3 %vm1740_vm0, %v4410_v60  ;;  %v4080_v42 = vld [vmem:[#allocation5 + $0x23c] sm:$0xf]  ;;  %v3484_v44 = vor.u32 %v4175_v36, %v3483_v35  ;;  %v3488_v45 = vor.u32 %v4143_v38, %v3485_v39  ;;  %v3227_v46 = vld [vmem:[#allocation5 + $0x230] sm:$0xf]  ;;  %v4079_v48 = vld [vmem:[#allocation5 + $0x234] sm:$0xf] }
  0x36   :  { %1853 = vmatpush.bf16.msra.mxu0 %v3468_v57  ;;  %v3237_v43 = vld [vmem:[#allocation5 + $0x338] sm:$0xf0]  ;;  %v4111_v47 = vld [vmem:[#allocation5 + $0x32c] sm:$0xf0]  ;;  %v3229_v51 = vld [vmem:[#allocation5 + $0x330] sm:$0xf0] }
  0x37   :  { %1879 = vmatpush.bf16.msra.mxu2 %v3476_v49  ;;  %v3236_v49 = vor.u32 %v4112_v41, %v3235_v40  ;;  %v3240_v50 = vor.u32 %v4080_v42, %v3237_v43  ;;  %v2979_v52 = vld [vmem:[#allocation5 + $0x38] sm:$0xf]  ;;  %v4016_v54 = vld [vmem:[#allocation5 + $0x3c] sm:$0xf]  ;;  %v4242_v57 = vld [vmem:[#allocation5 + $0x744] sm:$0xf0] }
  0x38   :  { %1892 = vmatpush.bf16.msra.mxu3 %v3480_v56  ;;  %1866 = vmatpush.bf16.msra.mxu1 %v3472_v61  ;;  %v4048_v53 = vld [vmem:[#allocation5 + $0x134] sm:$0xf0]  ;;  %v2981_v55 = vld [vmem:[#allocation5 + $0x138] sm:$0xf0]  ;;  %v3763_v56 = vld [vmem:[#allocation5 + $0x648] sm:$0xf]  ;;  %v3228_v61 = vor.u32 %v4111_v47, %v3227_v46 }
  0x39   :  { %v4210_v58 = vld [vmem:[#allocation5 + $0x64c] sm:$0xf]  ;;  %v2971_v63 = vld [vmem:[#allocation5 + $0x30] sm:$0xf]  ;;  %v4015_v1 = vld [vmem:[#allocation5 + $0x34] sm:$0xf]  ;;  %v2980_v2 = vor.u32 %v4048_v53, %v2979_v52  ;;  %v2984_v3 = vor.u32 %v4016_v54, %v2981_v55 }
  0x3a   :  { %1854 = vmatpush.bf16.msra.mxu0 %v3212_v8  ;;  %v3765_v59 = vld [vmem:[#allocation5 + $0x748] sm:$0xf0]  ;;  %v4047_v0 = vld [vmem:[#allocation5 + $0x12c] sm:$0xf0]  ;;  %v2973_v4 = vld [vmem:[#allocation5 + $0x130] sm:$0xf0] }
  0x3b   :  { %1880 = vmatpush.bf16.msra.mxu2 %v3220_v62  ;;  %v3232_v62 = vor.u32 %v4079_v48, %v3229_v51  ;;  %v3755_v5 = vld [vmem:[#allocation5 + $0x640] sm:$0xf]  ;;  %v3768_v8 = vor.u32 %v4210_v58, %v3765_v59  ;;  %v4209_v9 = vld [vmem:[#allocation5 + $0x644] sm:$0xf]  ;;  %v3507_v11 = vld [vmem:[#allocation5 + $0x448] sm:$0xf]  ;;  %v2972_v15 = vor.u32 %v4047_v0, %v2971_v63  ;;  %v2976_v16 = vor.u32 %v4015_v1, %v2973_v4 }
  0x3c   :  { %1893 = vmatpush.bf16.msra.mxu3 %v3224_v7  ;;  %1867 = vmatpush.bf16.msra.mxu1 %v3216_v12  ;;  %v4241_v6 = vld [vmem:[#allocation5 + $0x73c] sm:$0xf0]  ;;  %v3764_v7 = vor.u32 %v4242_v57, %v3763_v56  ;;  %v3757_v10 = vld [vmem:[#allocation5 + $0x740] sm:$0xf0]  ;;  %v4178_v12 = vld [vmem:[#allocation5 + $0x544] sm:$0xf0] }
  0x3d   :  { %v3509_v14 = vld [vmem:[#allocation5 + $0x548] sm:$0xf0]  ;;  %v3760_v18 = vor.u32 %v4209_v9, %v3757_v10  ;;  %v3499_v19 = vld [vmem:[#allocation5 + $0x440] sm:$0xf]  ;;  %v3508_v20 = vor.u32 %v4178_v12, %v3507_v11  ;;  %v4145_v23 = vld [vmem:[#allocation5 + $0x444] sm:$0xf] }
  0x3e   :  { %1855 = vmatpush.bf16.msra.mxu0 %v2956_v25  ;;  %v4177_v22 = vld [vmem:[#allocation5 + $0x53c] sm:$0xf0]  ;;  %v3251_v25 = vld [vmem:[#allocation5 + $0x248] sm:$0xf]  ;;  %v4081_v33 = vld [vmem:[#allocation5 + $0x244] sm:$0xf] }
  0x3f   :  { %1881 = vmatpush.bf16.msra.mxu2 %v2964_v13  ;;  %v4146_v13 = vld [vmem:[#allocation5 + $0x44c] sm:$0xf]  ;;  %v4114_v26 = vld [vmem:[#allocation5 + $0x344] sm:$0xf0]  ;;  %v3500_v27 = vor.u32 %v4177_v22, %v3499_v19  ;;  %v4113_v32 = vld [vmem:[#allocation5 + $0x33c] sm:$0xf0] }
  0x40   :  { %1894 = vmatpush.bf16.msra.mxu3 %v2968_v24  ;;  %1868 = vmatpush.bf16.msra.mxu1 %v2960_v28  ;;  %v3512_v21 = vor.u32 %v4146_v13, %v3509_v14  ;;  %v3501_v24 = vld [vmem:[#allocation5 + $0x540] sm:$0xf0]  ;;  %v2995_v35 = vld [vmem:[#allocation5 + $0x48] sm:$0xf]  ;;  %v3252_v36 = vor.u32 %v4114_v26, %v3251_v25  ;;  %v4018_v39 = vld [vmem:[#allocation5 + $0x4c] sm:$0xf] }
  0x41   :  { %3953 = vmatmul.msk.bf16.vlgmr.msra.gmra.mxu0 %vm1740_vm0, %v4410_v60  ;;  %v3504_v28 = vor.u32 %v4145_v23, %v3501_v24  ;;  %v4050_v38 = vld [vmem:[#allocation5 + $0x144] sm:$0xf0]  ;;  %v2997_v40 = vld [vmem:[#allocation5 + $0x148] sm:$0xf0]  ;;  %v2987_v43 = vld [vmem:[#allocation5 + $0x40] sm:$0xf] }
  0x42   :  { %1904 = vmatpush.bf16.msrb.mxu0 %v3740_v30  ;;  %3955 = vmatmul.msk.bf16.vlgmr.msra.gmra.mxu2 %vm1740_vm0, %v4410_v60  ;;  %v3253_v30 = vld [vmem:[#allocation5 + $0x348] sm:$0xf0]  ;;  %v2989_v46 = vld [vmem:[#allocation5 + $0x140] sm:$0xf0]  ;;  %v3779_v47 = vld [vmem:[#allocation5 + $0x658] sm:$0xf]  ;;  %v2996_v52 = vor.u32 %v4050_v38, %v2995_v35  ;;  %v3000_v53 = vor.u32 %v4018_v39, %v2997_v40 }
  0x43   :  { %1930 = vmatpush.bf16.msrb.mxu2 %v3748_v17  ;;  %3954 = vmatmul.msk.bf16.vlgmr.msra.gmra.mxu1 %vm1740_vm0, %v4410_v60  ;;  %v3756_v17 = vor.u32 %v4241_v6, %v3755_v5  ;;  %v4244_v48 = vld [vmem:[#allocation5 + $0x754] sm:$0xf0]  ;;  %v3771_v51 = vld [vmem:[#allocation5 + $0x650] sm:$0xf]  ;;  %v4211_v55 = vld [vmem:[#allocation5 + $0x654] sm:$0xf] }
  0x44   :  { %1943 = vmatpush.bf16.msrb.mxu3 %v3752_v29  ;;  %1917 = vmatpush.bf16.msrb.mxu1 %v3744_v31  ;;  %v4082_v29 = vld [vmem:[#allocation5 + $0x24c] sm:$0xf]  ;;  %v3243_v31 = vld [vmem:[#allocation5 + $0x240] sm:$0xf]  ;;  %v4243_v54 = vld [vmem:[#allocation5 + $0x74c] sm:$0xf0]  ;;  %v3780_v59 = vor.u32 %v4244_v48, %v3779_v47 }
  0x45   :  { %3956 = vmatmul.msk.bf16.vlgmr.msra.gmra.mxu3 %vm1740_vm0, %v4410_v60  ;;  %v3244_v41 = vor.u32 %v4113_v32, %v3243_v31  ;;  %v3773_v56 = vld [vmem:[#allocation5 + $0x750] sm:$0xf0]  ;;  %v4180_v63 = vld [vmem:[#allocation5 + $0x554] sm:$0xf0]  ;;  %v3772_v0 = vor.u32 %v4243_v54, %v3771_v51  ;;  %v3515_v4 = vld [vmem:[#allocation5 + $0x450] sm:$0xf] }
  0x46   :  { %1905 = vmatpush.bf16.msrb.mxu0 %v3484_v44  ;;  %v4049_v44 = vld [vmem:[#allocation5 + $0x13c] sm:$0xf0]  ;;  %v3776_v1 = vor.u32 %v4211_v55, %v3773_v56  ;;  %v4179_v5 = vld [vmem:[#allocation5 + $0x54c] sm:$0xf0]  ;;  %v4147_v6 = vld [vmem:[#allocation5 + $0x454] sm:$0xf] }
  0x47   :  { %1931 = vmatpush.bf16.msrb.mxu2 %v3492_v34  ;;  %v3245_v34 = vld [vmem:[#allocation5 + $0x340] sm:$0xf0]  ;;  %v2988_v57 = vor.u32 %v4049_v44, %v2987_v43  ;;  %v3516_v10 = vor.u32 %v4179_v5, %v3515_v4  ;;  %v3267_v12 = vld [vmem:[#allocation5 + $0x258] sm:$0xf]  ;;  %v4084_v14 = vld [vmem:[#allocation5 + $0x25c] sm:$0xf] }
  0x48   :  { %1944 = vmatpush.bf16.msrb.mxu3 %v3496_v37  ;;  %1918 = vmatpush.bf16.msrb.mxu1 %v3488_v45  ;;  %v3256_v37 = vor.u32 %v4082_v29, %v3253_v30  ;;  %v3248_v42 = vor.u32 %v4081_v33, %v3245_v34  ;;  %v4017_v45 = vld [vmem:[#allocation5 + $0x44] sm:$0xf]  ;;  %v4116_v13 = vld [vmem:[#allocation5 + $0x354] sm:$0xf0]  ;;  %v3261_v19 = vld [vmem:[#allocation5 + $0x350] sm:$0xf0] }
  0x49   :  { %v2992_v58 = vor.u32 %v4017_v45, %v2989_v46  ;;  %v4052_v23 = vld [vmem:[#allocation5 + $0x154] sm:$0xf0]  ;;  %v4020_v24 = vld [vmem:[#allocation5 + $0x5c] sm:$0xf]  ;;  %v4051_v29 = vld [vmem:[#allocation5 + $0x14c] sm:$0xf0] }
  0x4a   :  { %1906 = vmatpush.bf16.msrb.mxu0 %v3228_v61  ;;  %v3013_v25 = vld [vmem:[#allocation5 + $0x158] sm:$0xf0]  ;;  %v4019_v30 = vld [vmem:[#allocation5 + $0x54] sm:$0xf]  ;;  %v3795_v32 = vld [vmem:[#allocation5 + $0x668] sm:$0xf] }
  0x4b   :  { %1932 = vmatpush.bf16.msrb.mxu2 %v3236_v49  ;;  %v4212_v49 = vld [vmem:[#allocation5 + $0x65c] sm:$0xf]  ;;  %v3005_v31 = vld [vmem:[#allocation5 + $0x150] sm:$0xf0]  ;;  %v4246_v33 = vld [vmem:[#allocation5 + $0x764] sm:$0xf0]  ;;  %v3016_v38 = vor.u32 %v4020_v24, %v3013_v25 }
  0x4c   :  { %1945 = vmatpush.bf16.msrb.mxu3 %v3240_v50  ;;  %1919 = vmatpush.bf16.msrb.mxu1 %v3232_v62  ;;  %v3781_v50 = vld [vmem:[#allocation5 + $0x758] sm:$0xf0]  ;;  %v3523_v62 = vld [vmem:[#allocation5 + $0x458] sm:$0xf]  ;;  %v4214_v34 = vld [vmem:[#allocation5 + $0x66c] sm:$0xf]  ;;  %v3008_v43 = vor.u32 %v4019_v30, %v3005_v31  ;;  %v3796_v44 = vor.u32 %v4246_v33, %v3795_v32 }
  0x4d   :  { %v3784_v61 = vor.u32 %v4212_v49, %v3781_v50  ;;  %v3797_v35 = vld [vmem:[#allocation5 + $0x768] sm:$0xf0]  ;;  %v4245_v39 = vld [vmem:[#allocation5 + $0x75c] sm:$0xf0]  ;;  %v4213_v40 = vld [vmem:[#allocation5 + $0x664] sm:$0xf] }
  0x4e   :  { %1907 = vmatpush.bf16.msrb.mxu0 %v2972_v15  ;;  %v3269_v15 = vld [vmem:[#allocation5 + $0x358] sm:$0xf0]  ;;  %v3800_v45 = vor.u32 %v4214_v34, %v3797_v35  ;;  %v3539_v46 = vld [vmem:[#allocation5 + $0x468] sm:$0xf]  ;;  %v4150_v50 = vld [vmem:[#allocation5 + $0x46c] sm:$0xf] }
  0x4f   :  { %1933 = vmatpush.bf16.msrb.mxu2 %v2980_v2  ;;  %v4148_v2 = vld [vmem:[#allocation5 + $0x45c] sm:$0xf]  ;;  %v3272_v22 = vor.u32 %v4084_v14, %v3269_v15  ;;  %v4182_v47 = vld [vmem:[#allocation5 + $0x564] sm:$0xf0]  ;;  %v3541_v51 = vld [vmem:[#allocation5 + $0x568] sm:$0xf0] }
  0x50   :  { %1946 = vmatpush.bf16.msrb.mxu3 %v2984_v3  ;;  %1920 = vmatpush.bf16.msrb.mxu1 %v2976_v16  ;;  %v3525_v3 = vld [vmem:[#allocation5 + $0x558] sm:$0xf0]  ;;  %v3259_v16 = vld [vmem:[#allocation5 + $0x250] sm:$0xf]  ;;  %v4149_v54 = vld [vmem:[#allocation5 + $0x464] sm:$0xf]  ;;  %v3540_v56 = vor.u32 %v4182_v47, %v3539_v46 }
  0x51   :  { %3957 = vmatmul.msk.bf16.vlgmr.msrb.gmra.mxu0 %vm1740_vm0, %v4410_v60  ;;  %v3528_v9 = vor.u32 %v4148_v2, %v3525_v3  ;;  %v3533_v55 = vld [vmem:[#allocation5 + $0x560] sm:$0xf0]  ;;  %v4117_v2 = vld [vmem:[#allocation5 + $0x35c] sm:$0xf0]  ;;  %v3027_v5 = vld [vmem:[#allocation5 + $0x68] sm:$0xf] }
  0x52   :  { %1956 = vmatpush.bf16.msra.mxu0 %v3756_v17  ;;  %3959 = vmatmul.msk.bf16.vlgmr.msrb.gmra.mxu2 %vm1740_vm0, %v4410_v60  ;;  %v4115_v17 = vld [vmem:[#allocation5 + $0x34c] sm:$0xf0]  ;;  %v4085_v3 = vld [vmem:[#allocation5 + $0x264] sm:$0xf]  ;;  %v4053_v14 = vld [vmem:[#allocation5 + $0x15c] sm:$0xf0] }
  0x53   :  { %1982 = vmatpush.bf16.msra.mxu2 %v3764_v7  ;;  %3958 = vmatmul.msk.bf16.vlgmr.msrb.gmra.mxu1 %vm1740_vm0, %v4410_v60  ;;  %v3517_v7 = vld [vmem:[#allocation5 + $0x550] sm:$0xf0]  ;;  %v3260_v26 = vor.u32 %v4115_v17, %v3259_v16  ;;  %v3277_v4 = vld [vmem:[#allocation5 + $0x360] sm:$0xf0]  ;;  %v3811_v17 = vld [vmem:[#allocation5 + $0x678] sm:$0xf] }
  0x54   :  { %1995 = vmatpush.bf16.msra.mxu3 %v3768_v8  ;;  %1969 = vmatpush.bf16.msra.mxu1 %v3760_v18  ;;  %v3524_v8 = vor.u32 %v4180_v63, %v3523_v62  ;;  %v3520_v11 = vor.u32 %v4147_v6, %v3517_v7  ;;  %v4083_v18 = vld [vmem:[#allocation5 + $0x254] sm:$0xf]  ;;  %v4118_v62 = vld [vmem:[#allocation5 + $0x364] sm:$0xf0]  ;;  %v4086_v63 = vld [vmem:[#allocation5 + $0x26c] sm:$0xf] }
  0x55   :  { %3960 = vmatmul.msk.bf16.vlgmr.msrb.gmra.mxu3 %vm1740_vm0, %v4410_v60  ;;  %v4021_v15 = vld [vmem:[#allocation5 + $0x64] sm:$0xf]  ;;  %v4247_v24 = vld [vmem:[#allocation5 + $0x76c] sm:$0xf0]  ;;  %v4215_v25 = vld [vmem:[#allocation5 + $0x674] sm:$0xf] }
  0x56   :  { %1957 = vmatpush.bf16.msra.mxu0 %v3500_v27  ;;  %v3264_v27 = vor.u32 %v4083_v18, %v3261_v19  ;;  %v3021_v16 = vld [vmem:[#allocation5 + $0x160] sm:$0xf0]  ;;  %v4248_v18 = vld [vmem:[#allocation5 + $0x774] sm:$0xf0]  ;;  %v4216_v19 = vld [vmem:[#allocation5 + $0x67c] sm:$0xf] }
  0x57   :  { %1983 = vmatpush.bf16.msra.mxu2 %v3508_v20  ;;  %v3011_v20 = vld [vmem:[#allocation5 + $0x58] sm:$0xf]  ;;  %v4152_v35 = vld [vmem:[#allocation5 + $0x47c] sm:$0xf]  ;;  %vm2770_vm2 = vcmask 1044484   ;;  %vm2760_vm3 = vcmask 1040384  }
  0x58   :  { %1996 = vmatpush.bf16.msra.mxu3 %v3512_v21  ;;  %1970 = vmatpush.bf16.msra.mxu1 %v3504_v28  ;;  %v3268_v21 = vor.u32 %v4116_v13, %v3267_v12  ;;  %v3003_v28 = vld [vmem:[#allocation5 + $0x50] sm:$0xf]  ;;  %v3280_v12 = vor.u32 %v4085_v3, %v3277_v4  ;;  %v3019_v13 = vld [vmem:[#allocation5 + $0x60] sm:$0xf]  ;;  %v3555_v31 = vld [vmem:[#allocation5 + $0x478] sm:$0xf] }
  0x59   :  { %v4184_v32 = vld [vmem:[#allocation5 + $0x574] sm:$0xf0]  ;;  %v4088_v47 = vld [vmem:[#allocation5 + $0x27c] sm:$0xf]  ;;  %v4250_v3 = vld [vmem:[#allocation5 + $0x784] sm:$0xf0] }
  0x5a   :  { %1958 = vmatpush.bf16.msra.mxu0 %v3244_v41  ;;  %v3789_v41 = vld [vmem:[#allocation5 + $0x760] sm:$0xf0]  ;;  %v4120_v46 = vld [vmem:[#allocation5 + $0x374] sm:$0xf0]  ;;  %v4218_v4 = vld [vmem:[#allocation5 + $0x68c] sm:$0xf] }
  0x5b   :  { %1984 = vmatpush.bf16.msra.mxu2 %v3252_v36  ;;  %v3787_v36 = vld [vmem:[#allocation5 + $0x660] sm:$0xf]  ;;  %v3792_v49 = vor.u32 %v4213_v40, %v3789_v41  ;;  %v3549_v40 = vld [vmem:[#allocation5 + $0x570] sm:$0xf0]  ;;  %v3556_v41 = vor.u32 %v4184_v32, %v3555_v31  ;;  %v4090_v31 = vld [vmem:[#allocation5 + $0x28c] sm:$0xf] }
  0x5c   :  { %1997 = vmatpush.bf16.msra.mxu3 %v3256_v37  ;;  %1971 = vmatpush.bf16.msra.mxu1 %v3248_v42  ;;  %v3012_v37 = vor.u32 %v4052_v23, %v3011_v20  ;;  %v3004_v42 = vor.u32 %v4051_v29, %v3003_v28  ;;  %v3788_v48 = vor.u32 %v4245_v39, %v3787_v36  ;;  %v3813_v20 = vld [vmem:[#allocation5 + $0x778] sm:$0xf0]  ;;  %v4151_v39 = vld [vmem:[#allocation5 + $0x474] sm:$0xf]  ;;  %v3317_v32 = vld [vmem:[#allocation5 + $0x388] sm:$0xf0] }
  0x5d   :  { %v3024_v28 = vor.u32 %v4021_v15, %v3021_v16  ;;  %v3812_v29 = vor.u32 %v4248_v18, %v3811_v17  ;;  %v3816_v30 = vor.u32 %v4216_v19, %v3813_v20  ;;  %v3557_v36 = vld [vmem:[#allocation5 + $0x578] sm:$0xf0]  ;;  %v3571_v16 = vld [vmem:[#allocation5 + $0x488] sm:$0xf]  ;;  %v4154_v19 = vld [vmem:[#allocation5 + $0x48c] sm:$0xf] }
  0x5e   :  { %1959 = vmatpush.bf16.msra.mxu0 %v2988_v57  ;;  %v3544_v57 = vor.u32 %v4150_v50, %v3541_v51  ;;  %v4119_v50 = vld [vmem:[#allocation5 + $0x36c] sm:$0xf0]  ;;  %v4087_v51 = vld [vmem:[#allocation5 + $0x274] sm:$0xf]  ;;  %v4186_v17 = vld [vmem:[#allocation5 + $0x584] sm:$0xf0] }
  0x5f   :  { %1985 = vmatpush.bf16.msra.mxu2 %v2996_v52  ;;  %v3531_v52 = vld [vmem:[#allocation5 + $0x460] sm:$0xf]  ;;  %v3573_v20 = vld [vmem:[#allocation5 + $0x588] sm:$0xf0]  ;;  %vm2768_vm4 = vcmask 1041408   ;;  %vm2774_vm5 = vcmask 1046534  }
  0x60   :  { %1998 = vmatpush.bf16.msra.mxu3 %v3000_v53  ;;  %1972 = vmatpush.bf16.msra.mxu1 %v2992_v58  ;;  %v4181_v53 = vld [vmem:[#allocation5 + $0x55c] sm:$0xf0]  ;;  %vm2778_vm6 = vcmask 1045508   ;;  %vm2780_vm7 = vcmask 1043456   ;;  %s4380_s0 = smov [#allocation8]   ;;  %s2910_s30 = sshll.u32 %s4693_s3, 4  ;;  %s2911_s30 = int_to_ptr.hbm [resolvable:$true] %s2910_s30 }
  0x61   :  { %3961 = vmatmul.msk.bf16.vlgmr.msra.gmra.mxu0 %vm1740_vm0, %v4410_v60  ;;  %v3532_v58 = vor.u32 %v4181_v53, %v3531_v52  ;;  %v3293_v52 = vld [vmem:[#allocation5 + $0x370] sm:$0xf0]  ;;  %v3043_v53 = vld [vmem:[#allocation5 + $0x78] sm:$0xf]  ;;  %s2908_s2 = sshll.u32 %s4380_s0, 4  ;;  %s2909_s2 = int_to_ptr.vmem [resolvable:$true] %s2908_s2 }
  0x62   :  { %2008 = vmatpush.bf16.msrb.mxu0 %v3772_v0  ;;  %3963 = vmatmul.msk.bf16.vlgmr.msra.gmra.mxu2 %vm1740_vm0, %v4410_v60  ;;  %v3285_v0 = vld [vmem:[#allocation5 + $0x368] sm:$0xf0] }
  0x63   :  { %2034 = vmatpush.bf16.msrb.mxu2 %v3780_v59  ;;  %3962 = vmatmul.msk.bf16.vlgmr.msra.gmra.mxu1 %vm1740_vm0, %v4410_v60  ;;  %v3536_v59 = vor.u32 %v4149_v54, %v3533_v55  ;;  %v3288_v7 = vor.u32 %v4086_v63, %v3285_v0  ;;  %v4055_v63 = vld [vmem:[#allocation5 + $0x16c] sm:$0xf0]  ;;  %v4023_v0 = vld [vmem:[#allocation5 + $0x74] sm:$0xf] }
  0x64   :  { %2047 = vmatpush.bf16.msrb.mxu3 %v3784_v61  ;;  %2021 = vmatpush.bf16.msrb.mxu1 %v3776_v1  ;;  %v3283_v61 = vld [vmem:[#allocation5 + $0x268] sm:$0xf]  ;;  %v3275_v1 = vld [vmem:[#allocation5 + $0x260] sm:$0xf] }
  0x65   :  { %3964 = vmatmul.msk.bf16.vlgmr.msra.gmra.mxu3 %vm1740_vm0, %v4410_v60  ;;  %v3284_v6 = vor.u32 %v4118_v62, %v3283_v61  ;;  %v3296_v61 = vor.u32 %v4087_v51, %v3293_v52  ;;  %v3035_v62 = vld [vmem:[#allocation5 + $0x70] sm:$0xf]  ;;  %v4252_v51 = vld [vmem:[#allocation5 + $0x794] sm:$0xf0]  ;;  %v4220_v52 = vld [vmem:[#allocation5 + $0x69c] sm:$0xf] }
  0x66   :  { %2009 = vmatpush.bf16.msrb.mxu0 %v3516_v10  ;;  %v3029_v10 = vld [vmem:[#allocation5 + $0x168] sm:$0xf0] }
  0x67   :  { %2035 = vmatpush.bf16.msrb.mxu2 %v3524_v8  ;;  %v4054_v8 = vld [vmem:[#allocation5 + $0x164] sm:$0xf0] }
  0x68   :  { %2048 = vmatpush.bf16.msrb.mxu3 %v3528_v9  ;;  %2022 = vmatpush.bf16.msrb.mxu1 %v3520_v11  ;;  %v4022_v9 = vld [vmem:[#allocation5 + $0x6c] sm:$0xf]  ;;  %v3276_v11 = vor.u32 %v4117_v2, %v3275_v1  ;;  %v3037_v1 = vld [vmem:[#allocation5 + $0x170] sm:$0xf0]  ;;  %v3827_v2 = vld [vmem:[#allocation5 + $0x688] sm:$0xf] }
  0x69   :  { %v3032_v23 = vor.u32 %v4022_v9, %v3029_v10  ;;  %v4249_v9 = vld [vmem:[#allocation5 + $0x77c] sm:$0xf0]  ;;  %v4217_v10 = vld [vmem:[#allocation5 + $0x684] sm:$0xf] }
  0x6a   :  { %2010 = vmatpush.bf16.msrb.mxu0 %v3260_v26  ;;  %v3805_v26 = vld [vmem:[#allocation5 + $0x770] sm:$0xf0] }
  0x6b   :  { %2036 = vmatpush.bf16.msrb.mxu2 %v3268_v21  ;;  %v3803_v21 = vld [vmem:[#allocation5 + $0x670] sm:$0xf]  ;;  %v3808_v34 = vor.u32 %v4215_v25, %v3805_v26  ;;  %v3572_v25 = vor.u32 %v4186_v17, %v3571_v16  ;;  %v3576_v26 = vor.u32 %v4154_v19, %v3573_v20  ;;  %v4124_v16 = vld [vmem:[#allocation5 + $0x394] sm:$0xf0]  ;;  %v4092_v17 = vld [vmem:[#allocation5 + $0x29c] sm:$0xf] }
  0x6c   :  { %2049 = vmatpush.bf16.msrb.mxu3 %v3272_v22  ;;  %2023 = vmatpush.bf16.msrb.mxu1 %v3264_v27  ;;  %v3028_v22 = vor.u32 %v4054_v8, %v3027_v5  ;;  %v3020_v27 = vor.u32 %v4053_v14, %v3019_v13  ;;  %v3804_v33 = vor.u32 %v4247_v24, %v3803_v21  ;;  %v3829_v5 = vld [vmem:[#allocation5 + $0x788] sm:$0xf0]  ;;  %v3563_v21 = vld [vmem:[#allocation5 + $0x480] sm:$0xf]  ;;  %v3565_v24 = vld [vmem:[#allocation5 + $0x580] sm:$0xf0] }
  0x6d   :  { %v3040_v13 = vor.u32 %v4023_v0, %v3037_v1  ;;  %v3828_v14 = vor.u32 %v4250_v3, %v3827_v2  ;;  %v3832_v15 = vor.u32 %v4218_v4, %v3829_v5  ;;  %v3587_v1 = vld [vmem:[#allocation5 + $0x498] sm:$0xf]  ;;  %v4156_v5 = vld [vmem:[#allocation5 + $0x49c] sm:$0xf]  ;;  %v4123_v20 = vld [vmem:[#allocation5 + $0x38c] sm:$0xf0] }
  0x6e   :  { %2011 = vmatpush.bf16.msrb.mxu0 %v3004_v42  ;;  %v3560_v42 = vor.u32 %v4152_v35, %v3557_v36  ;;  %v4089_v35 = vld [vmem:[#allocation5 + $0x284] sm:$0xf]  ;;  %v4188_v2 = vld [vmem:[#allocation5 + $0x594] sm:$0xf0] }
  0x6f   :  { %2037 = vmatpush.bf16.msrb.mxu2 %v3012_v37  ;;  %v3547_v37 = vld [vmem:[#allocation5 + $0x470] sm:$0xf]  ;;  %v3309_v36 = vld [vmem:[#allocation5 + $0x380] sm:$0xf0] }
  0x70   :  { %2050 = vmatpush.bf16.msrb.mxu3 %v3016_v38  ;;  %2024 = vmatpush.bf16.msrb.mxu1 %v3008_v43  ;;  %v4183_v38 = vld [vmem:[#allocation5 + $0x56c] sm:$0xf0] }
  0x71   :  { %3965 = vmatmul.msk.bf16.vlgmr.msrb.gmra.mxu0 %vm1740_vm0, %v4410_v60  ;;  %v3548_v43 = vor.u32 %v4183_v38, %v3547_v37  ;;  %v3059_v37 = vld [vmem:[#allocation5 + $0x88] sm:$0xf] }
  0x72   :  { %2060 = vmatpush.bf16.msra.mxu0 %v3788_v48  ;;  %3967 = vmatmul.msk.bf16.vlgmr.msrb.gmra.mxu2 %vm1740_vm0, %v4410_v60  ;;  %v3301_v48 = vld [vmem:[#allocation5 + $0x378] sm:$0xf0] }
  0x73   :  { %2086 = vmatpush.bf16.msra.mxu2 %v3796_v44  ;;  %3966 = vmatmul.msk.bf16.vlgmr.msrb.gmra.mxu1 %vm1740_vm0, %v4410_v60  ;;  %v3552_v44 = vor.u32 %v4151_v39, %v3549_v40  ;;  %v3304_v55 = vor.u32 %v4088_v47, %v3301_v48  ;;  %v3320_v39 = vor.u32 %v4090_v31, %v3317_v32  ;;  %v4058_v40 = vld [vmem:[#allocation5 + $0x184] sm:$0xf0]  ;;  %v4025_v47 = vld [vmem:[#allocation5 + $0x84] sm:$0xf]  ;;  %v4468_v48 = vld [vmem:[#allocation2] sm:$0x1] }
  0x74   :  { %2099 = vmatpush.bf16.msra.mxu3 %v3800_v45  ;;  %2073 = vmatpush.bf16.msra.mxu1 %v3792_v49  ;;  %v3299_v45 = vld [vmem:[#allocation5 + $0x278] sm:$0xf]  ;;  %v3291_v49 = vld [vmem:[#allocation5 + $0x270] sm:$0xf] }
  0x75   :  { %3968 = vmatmul.msk.bf16.vlgmr.msrb.gmra.mxu3 %vm1740_vm0, %v4410_v60  ;;  %v3300_v54 = vor.u32 %v4120_v46, %v3299_v45  ;;  %v3051_v45 = vld [vmem:[#allocation5 + $0x80] sm:$0xf]  ;;  %v3067_v32 = vld [vmem:[#allocation5 + $0x90] sm:$0xf] }
  0x76   :  { %2061 = vmatpush.bf16.msra.mxu0 %v3532_v58  ;;  %v3045_v58 = vld [vmem:[#allocation5 + $0x178] sm:$0xf0]  ;;  %v4057_v46 = vld [vmem:[#allocation5 + $0x17c] sm:$0xf0] }
  0x77   :  { %2087 = vmatpush.bf16.msra.mxu2 %v3540_v56  ;;  %v4056_v56 = vld [vmem:[#allocation5 + $0x174] sm:$0xf0] }
  0x78   :  { %2100 = vmatpush.bf16.msra.mxu3 %v3544_v57  ;;  %2074 = vmatpush.bf16.msra.mxu1 %v3536_v59  ;;  %v4024_v57 = vld [vmem:[#allocation5 + $0x7c] sm:$0xf]  ;;  %v3292_v59 = vor.u32 %v4119_v50, %v3291_v49  ;;  %v3053_v49 = vld [vmem:[#allocation5 + $0x180] sm:$0xf0]  ;;  %v3843_v50 = vld [vmem:[#allocation5 + $0x698] sm:$0xf] }
  0x79   :  { %v3048_v8 = vor.u32 %v4024_v57, %v3045_v58  ;;  %v4251_v57 = vld [vmem:[#allocation5 + $0x78c] sm:$0xf0]  ;;  %v4219_v58 = vld [vmem:[#allocation5 + $0x694] sm:$0xf] }
  0x7a   :  { %2062 = vmatpush.bf16.msra.mxu0 %v3276_v11  ;;  %v3821_v11 = vld [vmem:[#allocation5 + $0x780] sm:$0xf0] }
  0x7b   :  { %2088 = vmatpush.bf16.msra.mxu2 %v3284_v6  ;;  %v3819_v6 = vld [vmem:[#allocation5 + $0x680] sm:$0xf] }
  0x7c   :  { %2101 = vmatpush.bf16.msra.mxu3 %v3288_v7  ;;  %2075 = vmatpush.bf16.msra.mxu1 %v3280_v12  ;;  %v3044_v7 = vor.u32 %v4056_v56, %v3043_v53  ;;  %v3036_v12 = vor.u32 %v4055_v63, %v3035_v62  ;;  %v3820_v18 = vor.u32 %v4249_v9, %v3819_v6  ;;  %v3845_v53 = vld [vmem:[#allocation5 + $0x798] sm:$0xf0]  ;;  %v4155_v9 = vld [vmem:[#allocation5 + $0x494] sm:$0xf] }
  0x7d   :  { %v3056_v62 = vor.u32 %v4025_v47, %v3053_v49  ;;  %v3844_v63 = vor.u32 %v4252_v51, %v3843_v50  ;;  %v3848_v0 = vor.u32 %v4220_v52, %v3845_v53  ;;  %v3589_v6 = vld [vmem:[#allocation5 + $0x598] sm:$0xf0] }
  0x7e   :  { %2063 = vmatpush.bf16.msra.mxu0 %v3020_v27 }
  0x7f   :  { %2089 = vmatpush.bf16.msra.mxu2 %v3028_v22  ;;  %v4185_v22 = vld [vmem:[#allocation5 + $0x57c] sm:$0xf0] }
  0x80   :  { %2102 = vmatpush.bf16.msra.mxu3 %v3032_v23  ;;  %2076 = vmatpush.bf16.msra.mxu1 %v3024_v28  ;;  %v4153_v23 = vld [vmem:[#allocation5 + $0x484] sm:$0xf]  ;;  %v3564_v27 = vor.u32 %v4185_v22, %v3563_v21  ;;  %v4091_v21 = vld [vmem:[#allocation5 + $0x294] sm:$0xf] }
  0x81   :  { %3969 = vmatmul.msk.bf16.vlgmr.msra.gmra.mxu0 %vm1740_vm0, %v4410_v60  ;;  %v3568_v28 = vor.u32 %v4153_v23, %v3565_v24  ;;  %v3325_v22 = vld [vmem:[#allocation5 + $0x390] sm:$0xf0]  ;;  %v3075_v24 = vld [vmem:[#allocation5 + $0x98] sm:$0xf] }
  0x82   :  { %2112 = vmatpush.bf16.msrb.mxu0 %v3804_v33  ;;  %3971 = vmatmul.msk.bf16.vlgmr.msra.gmra.mxu2 %vm1740_vm0, %v4410_v60  ;;  %v3307_v33 = vld [vmem:[#allocation5 + $0x280] sm:$0xf]  ;;  %v3328_v31 = vor.u32 %v4091_v21, %v3325_v22  ;;  %v3349_v21 = vld [vmem:[#allocation5 + $0x3a8] sm:$0xf0] }
  0x83   :  { %2138 = vmatpush.bf16.msrb.mxu2 %v3812_v29  ;;  %3970 = vmatmul.msk.bf16.vlgmr.msra.gmra.mxu1 %vm1740_vm0, %v4410_v60  ;;  %v3315_v29 = vld [vmem:[#allocation5 + $0x288] sm:$0xf]  ;;  %v3339_v22 = vld [vmem:[#allocation5 + $0x2a0] sm:$0xf] }
  0x84   :  { %2151 = vmatpush.bf16.msrb.mxu3 %v3816_v30  ;;  %2125 = vmatpush.bf16.msrb.mxu1 %v3808_v34  ;;  %v4122_v30 = vld [vmem:[#allocation5 + $0x384] sm:$0xf0]  ;;  %v4121_v34 = vld [vmem:[#allocation5 + $0x37c] sm:$0xf0] }
  0x85   :  { %3972 = vmatmul.msk.bf16.vlgmr.msra.gmra.mxu3 %vm1740_vm0, %v4410_v60  ;;  %v3824_v60 = vor.u32 %v4217_v10, %v3821_v11  ;;  %v3316_v38 = vor.u32 %v4122_v30, %v3315_v29  ;;  %v3581_v10 = vld [vmem:[#allocation5 + $0x590] sm:$0xf0]  ;;  %v3588_v11 = vor.u32 %v4188_v2, %v3587_v1  ;;  %v3077_v29 = vld [vmem:[#allocation5 + $0x198] sm:$0xf0]  ;;  %v3595_v1 = vld [vmem:[#allocation5 + $0x4a0] sm:$0xf] }
  0x86   :  { %2113 = vmatpush.bf16.msrb.mxu0 %v3548_v43  ;;  %v3308_v43 = vor.u32 %v4121_v34, %v3307_v33  ;;  %v4059_v33 = vld [vmem:[#allocation5 + $0x18c] sm:$0xf0]  ;;  %v4027_v34 = vld [vmem:[#allocation5 + $0x94] sm:$0xf]  ;;  %v4189_v2 = vld [vmem:[#allocation5 + $0x59c] sm:$0xf0] }
  0x87   :  { %2139 = vmatpush.bf16.msrb.mxu2 %v3556_v41  ;;  %v4026_v41 = vld [vmem:[#allocation5 + $0x8c] sm:$0xf]  ;;  %v3068_v49 = vor.u32 %v4059_v33, %v3067_v32  ;;  %v4504_v32 = vld [vmem:[#allocation5 + $0xa8] sm:$0xf] }
  0x88   :  { %2152 = vmatpush.bf16.msrb.mxu3 %v3560_v42  ;;  %2126 = vmatpush.bf16.msrb.mxu1 %v3552_v44  ;;  %v3061_v42 = vld [vmem:[#allocation5 + $0x188] sm:$0xf0]  ;;  %v3312_v44 = vor.u32 %v4089_v35, %v3309_v36  ;;  %v3069_v35 = vld [vmem:[#allocation5 + $0x190] sm:$0xf0]  ;;  %v3859_v36 = vld [vmem:[#allocation5 + $0x6a8] sm:$0xf] }
  0x89   :  { %v3064_v56 = vor.u32 %v4026_v41, %v3061_v42  ;;  %v3072_v50 = vor.u32 %v4027_v34, %v3069_v35  ;;  %v4506_v33 = vld [vmem:[#allocation5 + $0x1a4] sm:$0xf0]  ;;  %v4508_v34 = vld [vmem:[#allocation5 + $0xac] sm:$0xf] }
  0x8a   :  { %2114 = vmatpush.bf16.msrb.mxu0 %v3292_v59  ;;  %v3837_v59 = vld [vmem:[#allocation5 + $0x790] sm:$0xf0] }
  0x8b   :  { %2140 = vmatpush.bf16.msrb.mxu2 %v3300_v54  ;;  %v3835_v54 = vld [vmem:[#allocation5 + $0x690] sm:$0xf]  ;;  %v3840_v4 = vor.u32 %v4219_v58, %v3837_v59  ;;  %v4190_v58 = vld [vmem:[#allocation5 + $0x5a4] sm:$0xf0] }
  0x8c   :  { %2153 = vmatpush.bf16.msrb.mxu3 %v3304_v55  ;;  %2127 = vmatpush.bf16.msrb.mxu1 %v3296_v61  ;;  %v3060_v55 = vor.u32 %v4058_v40, %v3059_v37  ;;  %v3052_v61 = vor.u32 %v4057_v46, %v3051_v45  ;;  %v3836_v3 = vor.u32 %v4251_v57, %v3835_v54  ;;  %v4254_v37 = vld [vmem:[#allocation5 + $0x7a4] sm:$0xf0]  ;;  %v3851_v40 = vld [vmem:[#allocation5 + $0x6a0] sm:$0xf]  ;;  %v3853_v45 = vld [vmem:[#allocation5 + $0x7a0] sm:$0xf0] }
  0x8d   :  { %v4490_v46 = vld [vmem:[#allocation7] sm:$0xff]  ;;  %v3603_v57 = vld [vmem:[#allocation5 + $0x4a8] sm:$0xf] }
  0x8e   :  { %2115 = vmatpush.bf16.msrb.mxu0 %v3036_v12  ;;  %v3592_v12 = vor.u32 %v4156_v5, %v3589_v6  ;;  %v334_v51 = vperm.slane %v4490_v46, 2  ;;  %v335_v52 = vperm.slane %v4490_v46, 3  ;;  %v332_v5 = vperm.slane %v4490_v46, 0 }
  0x8f   :  { %2141 = vmatpush.bf16.msrb.mxu2 %v3044_v7  ;;  %v3579_v7 = vld [vmem:[#allocation5 + $0x490] sm:$0xf]  ;;  %v333_v6 = vperm.slane %v4490_v46, 1 }
  0x90   :  { %2154 = vmatpush.bf16.msrb.mxu3 %v3048_v8  ;;  %2128 = vmatpush.bf16.msrb.mxu1 %v3040_v13  ;;  %v4187_v8 = vld [vmem:[#allocation5 + $0x58c] sm:$0xf0] }
  0x91   :  { %3973 = vmatmul.msk.bf16.vlgmr.msrb.gmra.mxu0 %vm1740_vm0, %v4468_v48  ;;  %v3580_v13 = vor.u32 %v4187_v8, %v3579_v7  ;;  %v3604_v7 = vor.u32 %v4190_v58, %v3603_v57  ;;  %v3092_v58 = vor.u32 %v4506_v33, %v4504_v32 }
  0x92   :  { %2164 = vmatpush.bf16.msra.mxu0 %v3820_v18  ;;  %3975 = vmatmul.msk.bf16.vlgmr.msrb.gmra.mxu2 %vm1740_vm0, %v4468_v48  ;;  %v3333_v18 = vld [vmem:[#allocation5 + $0x398] sm:$0xf0] }
  0x93   :  { %2190 = vmatpush.bf16.msra.mxu2 %v3828_v14  ;;  %3974 = vmatmul.msk.bf16.vlgmr.msrb.gmra.mxu1 %vm1740_vm0, %v4468_v48  ;;  %v3584_v14 = vor.u32 %v4155_v9, %v3581_v10  ;;  %v336_v9 = vperm.slane %v4490_v46, 4  ;;  %v337_v10 = vperm.slane %v4490_v46, 5 }
  0x94   :  { %2203 = vmatpush.bf16.msra.mxu3 %v3832_v15  ;;  %2177 = vmatpush.bf16.msra.mxu1 %v3824_v60  ;;  %v3331_v15 = vld [vmem:[#allocation5 + $0x298] sm:$0xf]  ;;  %v3323_v60 = vld [vmem:[#allocation5 + $0x290] sm:$0xf] }
  0x95   :  { %3976 = vmatmul.msk.bf16.vlgmr.msrb.gmra.mxu3 %vm1740_vm0, %v4468_v48  ;;  %v3324_v30 = vor.u32 %v4123_v20, %v3323_v60  ;;  %v4094_v20 = vld [vmem:[#allocation5 + $0x2ac] sm:$0xf] }
  0x96   :  { %2165 = vmatpush.bf16.msra.mxu0 %v3564_v27  ;;  %v4060_v27 = vld [vmem:[#allocation5 + $0x194] sm:$0xf0] }
  0x97   :  { %2191 = vmatpush.bf16.msra.mxu2 %v3572_v25  ;;  %v3332_v25 = vor.u32 %v4124_v16, %v3331_v15  ;;  %v3076_v41 = vor.u32 %v4060_v27, %v3075_v24  ;;  %v338_v15 = vperm.slane %v4490_v46, 6  ;;  %v339_v16 = vperm.slane %v4490_v46, 7  ;;  %v4093_v27 = vld [vmem:[#allocation5 + $0x2a4] sm:$0xf] }
  0x98   :  { %2204 = vmatpush.bf16.msra.mxu3 %v3576_v26  ;;  %2178 = vmatpush.bf16.msra.mxu1 %v3568_v28  ;;  %v3336_v26 = vor.u32 %v4092_v17, %v3333_v18  ;;  %v4028_v28 = vld [vmem:[#allocation5 + $0x9c] sm:$0xf]  ;;  %v3347_v17 = vld [vmem:[#allocation5 + $0x2a8] sm:$0xf] }
  0x99   :  { %v3080_v42 = vor.u32 %v4028_v28, %v3077_v29  ;;  %v4126_v18 = vld [vmem:[#allocation5 + $0x3a4] sm:$0xf0]  ;;  %v3341_v28 = vld [vmem:[#allocation5 + $0x3a0] sm:$0xf0] }
  0x9a   :  { %2166 = vmatpush.bf16.msra.mxu0 %v3308_v43  ;;  %v4253_v43 = vld [vmem:[#allocation5 + $0x79c] sm:$0xf0] }
  0x9b   :  { %2192 = vmatpush.bf16.msra.mxu2 %v3316_v38  ;;  %v4222_v38 = vld [vmem:[#allocation5 + $0x6ac] sm:$0xf] }
  0x9c   :  { %2205 = vmatpush.bf16.msra.mxu3 %v3320_v39  ;;  %2179 = vmatpush.bf16.msra.mxu1 %v3312_v44  ;;  %v3861_v39 = vld [vmem:[#allocation5 + $0x7a8] sm:$0xf0]  ;;  %v4221_v44 = vld [vmem:[#allocation5 + $0x6a4] sm:$0xf] }
  0x9e   :  { %2167 = vmatpush.bf16.msra.mxu0 %v3052_v61  ;;  %v4478_v19 = vpop.f32.mrf.mxu0  ;;  %v4480_v23 = vpop.f32.mrf.mxu1  ;;  %v3852_v61 = vor.u32 %v4253_v43, %v3851_v40  ;;  %v4512_v40 = vld [vmem:[#allocation5 + $0xa0] sm:$0xf]  ;;  %v3344_v43 = vor.u32 %v4093_v27, %v3341_v28 }
  0x9f   :  { %2193 = vmatpush.bf16.msra.mxu2 %v3060_v55  ;;  %v3860_v55 = vor.u32 %v4254_v37, %v3859_v36  ;;  %v4501_v24 = vadd.f32 %v4478_v19, %v332_v5  ;;  %v1767_v29 = vadd.f32 %v4480_v23, %v333_v6  ;;  %v4510_v19 = vld [vmem:[#allocation5 + $0x1a8] sm:$0xf0]  ;;  %v4514_v23 = vld [vmem:[#allocation5 + $0x19c] sm:$0xf0] }
  0xa0   :  { %2206 = vmatpush.bf16.msra.mxu3 %v3064_v56  ;;  %2180 = vmatpush.bf16.msra.mxu1 %v3056_v62  ;;  %v3864_v56 = vor.u32 %v4222_v38, %v3861_v39  ;;  %v3856_v62 = vor.u32 %v4221_v44, %v3853_v45  ;;  %v3352_v39 = vor.u32 %v4094_v20, %v3349_v21  ;;  %v4029_v44 = vld [vmem:[#allocation5 + $0xa4] sm:$0xf]  ;;  %v4191_v20 = vld [vmem:[#allocation5 + $0x5ac] sm:$0xf0] }
  0xa1   :  { %3977 = vmatmul.msk.bf16.vlgmr.msra.gmra.mxu0 %vm1740_vm0, %v4468_v48  ;;  %v3085_v45 = vld [vmem:[#allocation5 + $0x1a0] sm:$0xf0] }
  0xa2   :  { %2216 = vmatpush.bf16.msrb.mxu0 %v3836_v3  ;;  %3979 = vmatmul.msk.bf16.vlgmr.msra.gmra.mxu2 %vm1740_vm0, %v4468_v48  ;;  %v4157_v3 = vld [vmem:[#allocation5 + $0x4a4] sm:$0xf] }
  0xa3   :  { %2242 = vmatpush.bf16.msrb.mxu2 %v3844_v63  ;;  %3978 = vmatmul.msk.bf16.vlgmr.msra.gmra.mxu1 %vm1740_vm0, %v4468_v48  ;;  %v4158_v63 = vld [vmem:[#allocation5 + $0x4ac] sm:$0xf] }
  0xa4   :  { %2255 = vmatpush.bf16.msrb.mxu3 %v3848_v0  ;;  %2229 = vmatpush.bf16.msrb.mxu1 %v3840_v4  ;;  %v3605_v0 = vld [vmem:[#allocation5 + $0x5a8] sm:$0xf0]  ;;  %v3597_v4 = vld [vmem:[#allocation5 + $0x5a0] sm:$0xf0] }
  0xa5   :  { %3980 = vmatmul.msk.bf16.vlgmr.msra.gmra.mxu3 %vm1740_vm0, %v4468_v48  ;;  %v1779_v47 = vpop.f32.mrf.mxu2  ;;  %v3608_v8 = vor.u32 %v4158_v63, %v3605_v0  ;;  %v3869_v63 = vld [vmem:[#allocation5 + $0x7b0] sm:$0xf0] }
  0xa6   :  { %2217 = vmatpush.bf16.msrb.mxu0 %v3580_v13  ;;  %v1792_v53 = vpop.f32.mrf.mxu3  ;;  %v1755_v54 = vpop.f32.mrf.mxu0  ;;  %v1780_v13 = vadd.f32 %v1779_v47, %v334_v51  ;;  %v3875_v47 = vld [vmem:[#allocation5 + $0x6b8] sm:$0xf] }
  0xa7   :  { %2243 = vmatpush.bf16.msrb.mxu2 %v3588_v11  ;;  %v1768_v59 = vpop.f32.mrf.mxu1  ;;  %v3596_v11 = vor.u32 %v4189_v2, %v3595_v1  ;;  %v4256_v51 = vld [vmem:[#allocation5 + $0x7b4] sm:$0xf0]  ;;  %v3084_v2 = vor.u32 %v4514_v23, %v4512_v40  ;;  %v3365_v23 = vld [vmem:[#allocation5 + $0x3b8] sm:$0xf0] }
  0xa8   :  { %2256 = vmatpush.bf16.msrb.mxu3 %v3592_v12  ;;  %2230 = vmatpush.bf16.msrb.mxu1 %v3584_v14  ;;  %v3600_v12 = vor.u32 %v4157_v3, %v3597_v4  ;;  %v1793_v14 = vadd.f32 %v1792_v53, %v335_v52  ;;  %v2578_v35 = vmax.f32 %v1780_v13, 0.0  ;;  %v4224_v52 = vld [vmem:[#allocation5 + $0x6bc] sm:$0xf]  ;;  %v2577_v53 = vmax.f32 %v1767_v29, 0.0 }
  0xa9   :  { %v3096_v59 = vor.u32 %v4508_v34, %v4510_v19  ;;  %v3088_v3 = vor.u32 %v4029_v44, %v3085_v45  ;;  %v3876_v6 = vor.u32 %v4256_v51, %v3875_v47  ;;  %v3363_v34 = vld [vmem:[#allocation5 + $0x2b8] sm:$0xf]  ;;  %v4095_v44 = vld [vmem:[#allocation5 + $0x2b4] sm:$0xf] }
  0xaa   :  { %2218 = vmatpush.bf16.msrb.mxu0 %v3324_v30  ;;  %v2579_v36 = vmax.f32 %v1793_v14, 0.0  ;;  %v4128_v19 = vld [vmem:[#allocation5 + $0x3b4] sm:$0xf0]  ;;  %v3357_v45 = vld [vmem:[#allocation5 + $0x3b0] sm:$0xf0] }
  0xab   :  { %2244 = vmatpush.bf16.msrb.mxu2 %v3332_v25  ;;  %v3107_v51 = vld [vmem:[#allocation5 + $0xb8] sm:$0xf] }
  0xac   :  { %2257 = vmatpush.bf16.msrb.mxu3 %v3336_v26  ;;  %2231 = vmatpush.bf16.msrb.mxu1 %v3328_v31  ;;  %v4125_v26 = vld [vmem:[#allocation5 + $0x39c] sm:$0xf0]  ;;  %v3348_v31 = vor.u32 %v4126_v18, %v3347_v17  ;;  %v2641_v57 = vpack.c.bf16 %v2579_v36, %v2578_v35  ;;  %v3621_v18 = vld [vmem:[#allocation5 + $0x5b8] sm:$0xf0] }
  0xad   :  { %v1781_v60 = vpop.f32.mrf.mxu2  ;;  %v4096_v35 = vld [vmem:[#allocation5 + $0x2bc] sm:$0xf] }
  0xae   :  { %2219 = vmatpush.bf16.msrb.mxu0 %v3068_v49  ;;  %v1794_v25 = vpop.f32.mrf.mxu3  ;;  %v1805_v30 = vpop.f32.mrf.mxu0  ;;  %v2576_v49 = vmax.f32 %v4501_v24, 0.0  ;;  %v3611_v60 = vld [vmem:[#allocation5 + $0x4b0] sm:$0xf]  ;;  %v2705_v21 = vrot.slane %v2641_v57, 6 }
  0xaf   :  { %2245 = vmatpush.bf16.msrb.mxu2 %v3076_v41  ;;  %v1806_v37 = vadd.f32 %v1805_v30, %v336_v9  ;;  %v4192_v9 = vld [vmem:[#allocation5 + $0x5b4] sm:$0xf0]  ;;  %v3613_v25 = vld [vmem:[#allocation5 + $0x5b0] sm:$0xf0]  ;;  %v3612_v32 = vor.u32 %v4191_v20, %v3611_v60 }
  0xb0   :  { %2258 = vmatpush.bf16.msrb.mxu3 %v3080_v42  ;;  %2232 = vmatpush.bf16.msrb.mxu1 %v3072_v50  ;;  %v1818_v38 = vpop.f32.mrf.mxu1  ;;  %v3340_v42 = vor.u32 %v4125_v26, %v3339_v22  ;;  %v2706_v26 = vrot.slane %v2641_v57, 1  ;;  %v3368_v57 = vor.u32 %v4096_v35, %v3365_v23 }
  0xb1   :  { %v1819_v41 = vadd.f32 %v1818_v38, %v337_v10  ;;  %v2580_v50 = vmax.f32 %v1806_v37, 0.0  ;;  %3981 = vmatmul.msk.bf16.vlgmr.msrb.gmra.mxu0 %vm1740_vm0, %v4468_v48  ;;  %v4160_v10 = vld [vmem:[#allocation5 + $0x4bc] sm:$0xf] }
  0xb2   :  { %2268 = vmatpush.bf16.msra.mxu0 %v3852_v61  ;;  %3983 = vmatmul.msk.bf16.vlgmr.msrb.gmra.mxu2 %vm1740_vm0, %v4468_v48  ;;  %v4255_v61 = vld [vmem:[#allocation5 + $0x7ac] sm:$0xf0]  ;;  %v2767_v36 = vsel %vm2764_vm1, %v2705_v21, %v2706_v26  ;;  %v4194_v26 = vld [vmem:[#allocation5 + $0x5c4] sm:$0xf0] }
  0xb3   :  { %2294 = vmatpush.bf16.msra.mxu2 %v3860_v55  ;;  %v2581_v54 = vmax.f32 %v1819_v41, 0.0  ;;  %3982 = vmatmul.msk.bf16.vlgmr.msrb.gmra.mxu1 %vm1740_vm0, %v4468_v48  ;;  %v3877_v55 = vld [vmem:[#allocation5 + $0x7b8] sm:$0xf0]  ;;  %v3355_v41 = vld [vmem:[#allocation5 + $0x2b0] sm:$0xf] }
  0xb4   :  { %2307 = vmatpush.bf16.msra.mxu3 %v3864_v56  ;;  %2281 = vmatpush.bf16.msra.mxu1 %v3856_v62  ;;  %v3867_v56 = vld [vmem:[#allocation5 + $0x6b0] sm:$0xf]  ;;  %v4223_v62 = vld [vmem:[#allocation5 + $0x6b4] sm:$0xf] }
  0xb5   :  { %3984 = vmatmul.msk.bf16.vlgmr.msrb.gmra.mxu3 %vm1740_vm0, %v4468_v48  ;;  %v2642_v0 = vpack.c.bf16 %v2581_v54, %v2580_v50  ;;  %v1831_v1 = vpop.f32.mrf.mxu2  ;;  %v3868_v14 = vor.u32 %v4255_v61, %v3867_v56  ;;  %v3872_v17 = vor.u32 %v4223_v62, %v3869_v63  ;;  %v3364_v56 = vor.u32 %v4128_v19, %v3363_v34  ;;  %v3099_v61 = vld [vmem:[#allocation5 + $0xb0] sm:$0xf]  ;;  %v3629_v34 = vld [vmem:[#allocation5 + $0x5c0] sm:$0xf0] }
  0xb6   :  { %2269 = vmatpush.bf16.msra.mxu0 %v3596_v11  ;;  %v1832_v4 = vadd.f32 %v1831_v1, %v338_v15  ;;  %v2640_v11 = vpack.c.bf16 %v2577_v53, %v2576_v49  ;;  %v1807_v13 = vpop.f32.mrf.mxu0  ;;  %v4159_v15 = vld [vmem:[#allocation5 + $0x4b4] sm:$0xf]  ;;  %v4063_v1 = vld [vmem:[#allocation5 + $0x1ac] sm:$0xf0] }
  0xb7   :  { %2295 = vmatpush.bf16.msra.mxu2 %v3604_v7  ;;  %v3880_v7 = vor.u32 %v4224_v52, %v3877_v55  ;;  %v2707_v27 = vrot.slane %v2642_v0, 4  ;;  %v2708_v28 = vrot.slane %v2642_v0, 7  ;;  %v3616_v33 = vor.u32 %v4159_v15, %v3613_v25  ;;  %v4064_v52 = vld [vmem:[#allocation5 + $0x1b4] sm:$0xf0]  ;;  %v3885_v13 = vld [vmem:[#allocation5 + $0x7c0] sm:$0xf0] }
  0xb8   :  { %2308 = vmatpush.bf16.msra.mxu3 %v3608_v8  ;;  %2282 = vmatpush.bf16.msra.mxu1 %v3600_v12  ;;  %v1844_v5 = vpop.f32.mrf.mxu3  ;;  %v3619_v8 = vld [vmem:[#allocation5 + $0x4b8] sm:$0xf]  ;;  %v2582_v22 = vmax.f32 %v1832_v4, 0.0  ;;  %v1820_v24 = vpop.f32.mrf.mxu1  ;;  %v2704_v30 = vrot.slane %v2640_v11, 3  ;;  %v3360_v0 = vor.u32 %v4095_v44, %v3357_v45  ;;  %v3891_v4 = vld [vmem:[#allocation5 + $0x6c8] sm:$0xf] }
  0xb9   :  { %v1845_v12 = vadd.f32 %v1844_v5, %v339_v16  ;;  %v3620_v46 = vor.u32 %v4192_v9, %v3619_v8  ;;  %v3624_v16 = vor.u32 %v4160_v10, %v3621_v18  ;;  %v2773_v37 = vsel %vm2770_vm2, %v2707_v27, %v2708_v28  ;;  %v4258_v5 = vld [vmem:[#allocation5 + $0x7c4] sm:$0xf0]  ;;  %v3883_v8 = vld [vmem:[#allocation5 + $0x6c0] sm:$0xf] }
  0xba   :  { %2270 = vmatpush.bf16.msra.mxu0 %v3340_v42  ;;  %v2763_v47 = vsel %vm2760_vm3, %v2640_v11, %v2704_v30  ;;  %v3108_v9 = vor.u32 %v4064_v52, %v3107_v51  ;;  %v4257_v11 = vld [vmem:[#allocation5 + $0x7bc] sm:$0xf0]  ;;  %v3100_v18 = vor.u32 %v4063_v1, %v3099_v61  ;;  %v3892_v24 = vor.u32 %v4258_v5, %v3891_v4  ;;  %v3635_v25 = vld [vmem:[#allocation5 + $0x4c8] sm:$0xf]  ;;  %v4098_v51 = vld [vmem:[#allocation5 + $0x2cc] sm:$0xf] }
  0xbb   :  { %2296 = vmatpush.bf16.msra.mxu2 %v3348_v31  ;;  %v2583_v29 = vmax.f32 %v1845_v12, 0.0  ;;  %v2769_v53 = vsel %vm2768_vm4, %v2763_v47, %v2767_v36  ;;  %v4225_v12 = vld [vmem:[#allocation5 + $0x6c4] sm:$0xf]  ;;  %v3884_v28 = vor.u32 %v4257_v11, %v3883_v8  ;;  %v3627_v30 = vld [vmem:[#allocation5 + $0x4c0] sm:$0xf]  ;;  %v3636_v36 = vor.u32 %v4194_v26, %v3635_v25 }
  0xbc   :  { %2309 = vmatpush.bf16.msra.mxu3 %v3352_v39  ;;  %2283 = vmatpush.bf16.msra.mxu1 %v3344_v43  ;;  %v4127_v43 = vld [vmem:[#allocation5 + $0x3ac] sm:$0xf0]  ;;  %v3379_v45 = vld [vmem:[#allocation5 + $0x2c8] sm:$0xf]  ;;  %v3381_v52 = vld [vmem:[#allocation5 + $0x3c8] sm:$0xf0] }
  0xbd   :  { %v2643_v31 = vpack.c.bf16 %v2583_v29, %v2582_v22  ;;  %v1833_v40 = vpop.f32.mrf.mxu2  ;;  %v3356_v63 = vor.u32 %v4127_v43, %v3355_v41  ;;  %v3888_v29 = vor.u32 %v4225_v12, %v3885_v13  ;;  %v4130_v47 = vld [vmem:[#allocation5 + $0x3c4] sm:$0xf0]  ;;  %v3115_v8 = vld [vmem:[#allocation5 + $0xc0] sm:$0xf]  ;;  %v4033_v13 = vld [vmem:[#allocation5 + $0xc4] sm:$0xf] }
  0xbe   :  { %2271 = vmatpush.bf16.msra.mxu0 %v3084_v2  ;;  %v4539_v50 = vpop.f32.mrf.mxu0  ;;  %v4031_v2 = vld [vmem:[#allocation5 + $0xb4] sm:$0xf]  ;;  %v4066_v1 = vld [vmem:[#allocation5 + $0x1c4] sm:$0xf0]  ;;  %v3899_v25 = vld [vmem:[#allocation5 + $0x6d0] sm:$0xf] }
  0xbf   :  { %2297 = vmatpush.bf16.msra.mxu2 %v3092_v58  ;;  %v2709_v38 = vrot.slane %v2643_v31, 2  ;;  %v2710_v39 = vrot.slane %v2643_v31, 5  ;;  %v4032_v58 = vld [vmem:[#allocation5 + $0xbc] sm:$0xf] }
  0xc0   :  { %2310 = vmatpush.bf16.msra.mxu3 %v3096_v59  ;;  %2284 = vmatpush.bf16.msra.mxu1 %v3088_v3  ;;  %v1846_v42 = vpop.f32.mrf.mxu3  ;;  %v4543_v55 = vpop.f32.mrf.mxu1  ;;  %v3109_v59 = vld [vmem:[#allocation5 + $0x1b8] sm:$0xf0]  ;;  %v3101_v3 = vld [vmem:[#allocation5 + $0x1b0] sm:$0xf0] }
  0xc1   :  { %v2777_v49 = vsel %vm2774_vm5, %v2709_v38, %v2710_v39  ;;  %3985 = vmatmul.msk.bf16.vlgmr.msra.gmra.mxu0 %vm1740_vm0, %v4468_v48  ;;  %v3112_v10 = vor.u32 %v4032_v58, %v3109_v59  ;;  %v3104_v60 = vor.u32 %v4031_v2, %v3101_v3  ;;  %v4097_v58 = vld [vmem:[#allocation5 + $0x2c4] sm:$0xf]  ;;  %v4034_v2 = vld [vmem:[#allocation5 + $0xcc] sm:$0xf] }
  0xc2   :  { %2320 = vmatpush.bf16.msrb.mxu0 %v3868_v14  ;;  %v2779_v54 = vsel %vm2778_vm6, %v2773_v37, %v2777_v49  ;;  %3987 = vmatmul.msk.bf16.vlgmr.msra.gmra.mxu2 %vm1740_vm0, %v4468_v48  ;;  %v4554_v14 = vld [vmem:[#allocation7 + $0x8] sm:$0xff]  ;;  %v3373_v59 = vld [vmem:[#allocation5 + $0x3c0] sm:$0xf0] }
  0xc3   :  { %2346 = vmatpush.bf16.msrb.mxu2 %v3876_v6  ;;  %v2781_v62 = vsel %vm2780_vm7, %v2769_v53, %v2779_v54  ;;  %3986 = vmatmul.msk.bf16.vlgmr.msra.gmra.mxu1 %vm1740_vm0, %v4468_v48  ;;  %v4226_v6 = vld [vmem:[#allocation5 + $0x6cc] sm:$0xf]  ;;  %v342_v20 = vperm.slane %v4554_v14, 2  ;;  %v343_v21 = vperm.slane %v4554_v14, 3  ;;  %v340_v19 = vperm.slane %v4554_v14, 0 }
  0xc4   :  { %2359 = vmatpush.bf16.msrb.mxu3 %v3880_v7  ;;  %2333 = vmatpush.bf16.msrb.mxu1 %v3872_v17  ;;  %2895 = vst [vmem:[#allocation8] sm:$0xff] %v2781_v62  ;;  %v3893_v7 = vld [vmem:[#allocation5 + $0x7c8] sm:$0xf0]  ;;  %v341_v35 = vperm.slane %v4554_v14, 1  ;;  %v344_v38 = vperm.slane %v4554_v14, 4  ;;  %v345_v39 = vperm.slane %v4554_v14, 5  ;;  %v3376_v12 = vor.u32 %v4097_v58, %v3373_v59 }
  0xc5   :  { %3988 = vmatmul.msk.bf16.vlgmr.msra.gmra.mxu3 %vm1740_vm0, %v4468_v48  ;;  %v1883_v17 = vpop.f32.mrf.mxu2  ;;  %v3896_v15 = vor.u32 %v4226_v6, %v3893_v7  ;;  %v346_v43 = vperm.slane %v4554_v14, 6  ;;  %v347_v44 = vperm.slane %v4554_v14, 7  ;;  %v3371_v53 = vld [vmem:[#allocation5 + $0x2c0] sm:$0xf]  ;;  %v4565_v54 = vadd.f32 %v4539_v50, %v340_v19  ;;  %v3125_v3 = vld [vmem:[#allocation5 + $0x1c8] sm:$0xf0] }
  0xc6   :  { %2321 = vmatpush.bf16.msrb.mxu0 %v3612_v32  ;;  %v1859_v27 = vpop.f32.mrf.mxu0  ;;  %v4193_v32 = vld [vmem:[#allocation5 + $0x5bc] sm:$0xf0]  ;;  %v1884_v41 = vadd.f32 %v1883_v17, %v342_v20  ;;  %v1871_v61 = vadd.f32 %v4543_v55, %v341_v35  ;;  %v3384_v7 = vor.u32 %v4098_v51, %v3381_v52  ;;  %v3117_v55 = vld [vmem:[#allocation5 + $0x1c0] sm:$0xf0]  ;;  %v3907_v17 = vld [vmem:[#allocation5 + $0x6d8] sm:$0xf] }
  0xc7   :  { %2347 = vmatpush.bf16.msrb.mxu2 %v3620_v46  ;;  %v4162_v46 = vld [vmem:[#allocation5 + $0x4cc] sm:$0xf]  ;;  %v3628_v40 = vor.u32 %v4193_v32, %v3627_v30  ;;  %v4260_v20 = vld [vmem:[#allocation5 + $0x7d4] sm:$0xf0]  ;;  %v4195_v51 = vld [vmem:[#allocation5 + $0x5cc] sm:$0xf0] }
  0xc8   :  { %2360 = vmatpush.bf16.msrb.mxu3 %v3624_v16  ;;  %2334 = vmatpush.bf16.msrb.mxu1 %v3616_v33  ;;  %v1896_v22 = vpop.f32.mrf.mxu3  ;;  %v3637_v16 = vld [vmem:[#allocation5 + $0x5c8] sm:$0xf0]  ;;  %v1872_v31 = vpop.f32.mrf.mxu1  ;;  %v4161_v33 = vld [vmem:[#allocation5 + $0x4c4] sm:$0xf]  ;;  %v2586_v4 = vmax.f32 %v1884_v41, 0.0  ;;  %v3908_v35 = vor.u32 %v4260_v20, %v3907_v17 }
  0xc9   :  { %v3640_v37 = vor.u32 %v4162_v46, %v3637_v16  ;;  %v3632_v23 = vor.u32 %v4161_v33, %v3629_v34  ;;  %v1897_v42 = vadd.f32 %v1896_v22, %v343_v21  ;;  %v4228_v21 = vld [vmem:[#allocation5 + $0x6dc] sm:$0xf]  ;;  %v2585_v22 = vmax.f32 %v1871_v61, 0.0  ;;  %v4227_v46 = vld [vmem:[#allocation5 + $0x6d4] sm:$0xf] }
  0xca   :  { %2322 = vmatpush.bf16.msrb.mxu0 %v3356_v63  ;;  %v3380_v63 = vor.u32 %v4130_v47, %v3379_v45  ;;  %v3901_v16 = vld [vmem:[#allocation5 + $0x7d0] sm:$0xf0]  ;;  %v3120_v33 = vor.u32 %v4033_v13, %v3117_v55  ;;  %v3653_v47 = vld [vmem:[#allocation5 + $0x5d8] sm:$0xf0]  ;;  %v3139_v20 = vld [vmem:[#allocation5 + $0xd8] sm:$0xf] }
  0xcb   :  { %2348 = vmatpush.bf16.msrb.mxu2 %v3364_v56  ;;  %v2587_v5 = vmax.f32 %v1897_v42, 0.0  ;;  %v3904_v45 = vor.u32 %v4227_v46, %v3901_v16  ;;  %v4099_v13 = vld [vmem:[#allocation5 + $0x2d4] sm:$0xf] }
  0xcc   :  { %2361 = vmatpush.bf16.msrb.mxu3 %v3368_v57  ;;  %2335 = vmatpush.bf16.msrb.mxu1 %v3360_v0  ;;  %v4129_v57 = vld [vmem:[#allocation5 + $0x3bc] sm:$0xf0]  ;;  %v3123_v0 = vld [vmem:[#allocation5 + $0xc8] sm:$0xf]  ;;  %v3389_v55 = vld [vmem:[#allocation5 + $0x3d0] sm:$0xf0] }
  0xcd   :  { %v1885_v49 = vpop.f32.mrf.mxu2  ;;  %v3372_v11 = vor.u32 %v4129_v57, %v3371_v53  ;;  %v2645_v26 = vpack.c.bf16 %v2587_v5, %v2586_v4  ;;  %v3124_v27 = vor.u32 %v4066_v1, %v3123_v0  ;;  %v4100_v4 = vld [vmem:[#allocation5 + $0x2dc] sm:$0xf] }
  0xce   :  { %2323 = vmatpush.bf16.msrb.mxu0 %v3100_v18  ;;  %v1909_v62 = vpop.f32.mrf.mxu0  ;;  %v2584_v18 = vmax.f32 %v4565_v54, 0.0  ;;  %v3643_v49 = vld [vmem:[#allocation5 + $0x4d0] sm:$0xf] }
  0xcf   :  { %2349 = vmatpush.bf16.msrb.mxu2 %v3108_v9  ;;  %v1910_v50 = vadd.f32 %v1909_v62, %v344_v38  ;;  %v4065_v9 = vld [vmem:[#allocation5 + $0x1bc] sm:$0xf0]  ;;  %v4196_v38 = vld [vmem:[#allocation5 + $0x5d4] sm:$0xf0]  ;;  %v2712_v52 = vrot.slane %v2645_v26, 6  ;;  %v2713_v57 = vrot.slane %v2645_v26, 1  ;;  %v3644_v0 = vor.u32 %v4195_v51, %v3643_v49 }
  0xd0   :  { %2362 = vmatpush.bf16.msrb.mxu3 %v3112_v10  ;;  %2336 = vmatpush.bf16.msrb.mxu1 %v3104_v60  ;;  %v1898_v56 = vpop.f32.mrf.mxu3  ;;  %v1922_v6 = vpop.f32.mrf.mxu1  ;;  %v3116_v32 = vor.u32 %v4065_v9, %v3115_v8  ;;  %v3397_v9 = vld [vmem:[#allocation5 + $0x3d8] sm:$0xf0] }
  0xd1   :  { %v1923_v10 = vadd.f32 %v1922_v6, %v345_v39  ;;  %v2588_v60 = vmax.f32 %v1910_v50, 0.0  ;;  %3989 = vmatmul.msk.bf16.vlgmr.msrb.gmra.mxu0 %vm1740_vm0, %v4468_v48  ;;  %v4164_v39 = vld [vmem:[#allocation5 + $0x4dc] sm:$0xf]  ;;  %v3645_v56 = vld [vmem:[#allocation5 + $0x5d0] sm:$0xf0]  ;;  %v2787_v5 = vsel %vm2764_vm1, %v2712_v52, %v2713_v57  ;;  %v3400_v26 = vor.u32 %v4100_v4, %v3397_v9 }
  0xd2   :  { %2372 = vmatpush.bf16.msra.mxu0 %v3884_v28  ;;  %3991 = vmatmul.msk.bf16.vlgmr.msrb.gmra.mxu2 %vm1740_vm0, %v4468_v48  ;;  %v3128_v28 = vor.u32 %v4034_v2, %v3125_v3  ;;  %v3395_v2 = vld [vmem:[#allocation5 + $0x2d8] sm:$0xf] }
  0xd3   :  { %2398 = vmatpush.bf16.msra.mxu2 %v3892_v24  ;;  %v2589_v24 = vmax.f32 %v1923_v10, 0.0  ;;  %3990 = vmatmul.msk.bf16.vlgmr.msrb.gmra.mxu1 %vm1740_vm0, %v4468_v48  ;;  %v4132_v3 = vld [vmem:[#allocation5 + $0x3d4] sm:$0xf0]  ;;  %v3387_v10 = vld [vmem:[#allocation5 + $0x2d0] sm:$0xf] }
  0xd4   :  { %2411 = vmatpush.bf16.msra.mxu3 %v3896_v15  ;;  %2385 = vmatpush.bf16.msra.mxu1 %v3888_v29  ;;  %v3909_v15 = vld [vmem:[#allocation5 + $0x7d8] sm:$0xf0]  ;;  %v4259_v29 = vld [vmem:[#allocation5 + $0x7cc] sm:$0xf0] }
  0xd5   :  { %3992 = vmatmul.msk.bf16.vlgmr.msrb.gmra.mxu3 %vm1740_vm0, %v4468_v48  ;;  %v2646_v30 = vpack.c.bf16 %v2589_v24, %v2588_v60  ;;  %v1935_v31 = vpop.f32.mrf.mxu2  ;;  %v3900_v42 = vor.u32 %v4259_v29, %v3899_v25  ;;  %v3396_v25 = vor.u32 %v4132_v3, %v3395_v2  ;;  %v3131_v29 = vld [vmem:[#allocation5 + $0xd0] sm:$0xf] }
  0xd6   :  { %2373 = vmatpush.bf16.msra.mxu0 %v3628_v40  ;;  %v1936_v34 = vadd.f32 %v1935_v31, %v346_v43  ;;  %v2644_v40 = vpack.c.bf16 %v2585_v22, %v2584_v18  ;;  %v1911_v41 = vpop.f32.mrf.mxu0  ;;  %v4163_v43 = vld [vmem:[#allocation5 + $0x4d4] sm:$0xf]  ;;  %v4067_v31 = vld [vmem:[#allocation5 + $0x1cc] sm:$0xf0] }
  0xd7   :  { %2399 = vmatpush.bf16.msra.mxu2 %v3636_v36  ;;  %v3912_v36 = vor.u32 %v4228_v21, %v3909_v15  ;;  %v2714_v58 = vrot.slane %v2646_v30, 4  ;;  %v2715_v59 = vrot.slane %v2646_v30, 7  ;;  %v3648_v1 = vor.u32 %v4163_v43, %v3645_v56  ;;  %v4068_v21 = vld [vmem:[#allocation5 + $0x1d4] sm:$0xf0]  ;;  %v3917_v41 = vld [vmem:[#allocation5 + $0x7e0] sm:$0xf0] }
  0xd8   :  { %2412 = vmatpush.bf16.msra.mxu3 %v3640_v37  ;;  %2386 = vmatpush.bf16.msra.mxu1 %v3632_v23  ;;  %v1948_v19 = vpop.f32.mrf.mxu3  ;;  %v3651_v37 = vld [vmem:[#allocation5 + $0x4d8] sm:$0xf]  ;;  %v2590_v53 = vmax.f32 %v1936_v34, 0.0  ;;  %v1924_v54 = vpop.f32.mrf.mxu1  ;;  %v2711_v62 = vrot.slane %v2644_v40, 3  ;;  %v3392_v30 = vor.u32 %v4099_v13, %v3389_v55  ;;  %v3923_v34 = vld [vmem:[#allocation5 + $0x6e8] sm:$0xf] }
  0xd9   :  { %v1949_v23 = vadd.f32 %v1948_v19, %v347_v44  ;;  %v3652_v14 = vor.u32 %v4196_v38, %v3651_v37  ;;  %v3656_v44 = vor.u32 %v4164_v39, %v3653_v47  ;;  %v2791_v50 = vsel %vm2770_vm2, %v2714_v58, %v2715_v59  ;;  %v4262_v19 = vld [vmem:[#allocation5 + $0x7e4] sm:$0xf0]  ;;  %v3915_v37 = vld [vmem:[#allocation5 + $0x6e0] sm:$0xf] }
  0xda   :  { %2374 = vmatpush.bf16.msra.mxu0 %v3372_v11  ;;  %v2784_v17 = vsel %vm2760_vm3, %v2644_v40, %v2711_v62  ;;  %v3140_v38 = vor.u32 %v4068_v21, %v3139_v20  ;;  %v4261_v40 = vld [vmem:[#allocation5 + $0x7dc] sm:$0xf0]  ;;  %v3132_v47 = vor.u32 %v4067_v31, %v3131_v29  ;;  %v3667_v43 = vld [vmem:[#allocation5 + $0x4e8] sm:$0xf]  ;;  %v3413_v20 = vld [vmem:[#allocation5 + $0x3e8] sm:$0xf0] }
  0xdb   :  { %2400 = vmatpush.bf16.msra.mxu2 %v3380_v63  ;;  %v2591_v61 = vmax.f32 %v1949_v23, 0.0  ;;  %v2788_v22 = vsel %vm2768_vm4, %v2784_v17, %v2787_v5  ;;  %v4229_v23 = vld [vmem:[#allocation5 + $0x6e4] sm:$0xf]  ;;  %v4198_v56 = vld [vmem:[#allocation5 + $0x5e4] sm:$0xf0]  ;;  %v3916_v58 = vor.u32 %v4261_v40, %v3915_v37 }
  0xdc   :  { %2413 = vmatpush.bf16.msra.mxu3 %v3384_v7  ;;  %2387 = vmatpush.bf16.msra.mxu1 %v3376_v12  ;;  %v4131_v12 = vld [vmem:[#allocation5 + $0x3cc] sm:$0xf0]  ;;  %v3920_v59 = vor.u32 %v4229_v23, %v3917_v41  ;;  %v3668_v4 = vor.u32 %v4198_v56, %v3667_v43  ;;  %v3411_v13 = vld [vmem:[#allocation5 + $0x2e8] sm:$0xf]  ;;  %v3403_v21 = vld [vmem:[#allocation5 + $0x2e0] sm:$0xf] }
  0xdd   :  { %v2647_v63 = vpack.c.bf16 %v2591_v61, %v2590_v53  ;;  %v1937_v8 = vpop.f32.mrf.mxu2  ;;  %v3388_v16 = vor.u32 %v4131_v12, %v3387_v10  ;;  %v3924_v53 = vor.u32 %v4262_v19, %v3923_v34  ;;  %v4166_v61 = vld [vmem:[#allocation5 + $0x4ec] sm:$0xf]  ;;  %v4134_v55 = vld [vmem:[#allocation5 + $0x3e4] sm:$0xf0]  ;;  %v4069_v37 = vld [vmem:[#allocation5 + $0x1dc] sm:$0xf0] }
  0xde   :  { %2375 = vmatpush.bf16.msra.mxu0 %v3116_v32  ;;  %v4585_v60 = vpop.f32.mrf.mxu0  ;;  %v4035_v32 = vld [vmem:[#allocation5 + $0xd4] sm:$0xf]  ;;  %v4038_v31 = vld [vmem:[#allocation5 + $0xec] sm:$0xf]  ;;  %v4037_v23 = vld [vmem:[#allocation5 + $0xe4] sm:$0xf] }
  0xdf   :  { %2401 = vmatpush.bf16.msra.mxu2 %v3124_v27  ;;  %v2716_v6 = vrot.slane %v2647_v63, 2  ;;  %v2717_v7 = vrot.slane %v2647_v63, 5  ;;  %v4036_v27 = vld [vmem:[#allocation5 + $0xdc] sm:$0xf]  ;;  %v4197_v63 = vld [vmem:[#allocation5 + $0x5dc] sm:$0xf0] }
  0xe0   :  { %2414 = vmatpush.bf16.msra.mxu3 %v3128_v28  ;;  %2388 = vmatpush.bf16.msra.mxu1 %v3120_v33  ;;  %v1950_v11 = vpop.f32.mrf.mxu3  ;;  %v4589_v15 = vpop.f32.mrf.mxu1  ;;  %v3141_v28 = vld [vmem:[#allocation5 + $0x1d8] sm:$0xf0]  ;;  %v3133_v33 = vld [vmem:[#allocation5 + $0x1d0] sm:$0xf0]  ;;  %v3939_v41 = vld [vmem:[#allocation5 + $0x6f8] sm:$0xf] }
  0xe1   :  { %v2794_v18 = vsel %vm2774_vm5, %v2716_v6, %v2717_v7  ;;  %3993 = vmatmul.msk.bf16.vlgmr.msra.gmra.mxu0 %vm1740_vm0, %v4468_v48  ;;  %v3144_v39 = vor.u32 %v4036_v27, %v3141_v28  ;;  %v3136_v49 = vor.u32 %v4035_v32, %v3133_v33  ;;  %v3405_v27 = vld [vmem:[#allocation5 + $0x3e0] sm:$0xf0]  ;;  %v3157_v32 = vld [vmem:[#allocation5 + $0x1e8] sm:$0xf0]  ;;  %v3931_v43 = vld [vmem:[#allocation5 + $0x6f0] sm:$0xf] }
  0xe2   :  { %2424 = vmatpush.bf16.msrb.mxu0 %v3900_v42  ;;  %v2795_v24 = vsel %vm2778_vm6, %v2791_v50, %v2794_v18  ;;  %3995 = vmatmul.msk.bf16.vlgmr.msra.gmra.mxu2 %vm1740_vm0, %v4468_v48  ;;  %v4600_v42 = vld [vmem:[#allocation7 + $0x10] sm:$0xff]  ;;  %v4102_v18 = vld [vmem:[#allocation5 + $0x2ec] sm:$0xf] }
  0xe3   :  { %2450 = vmatpush.bf16.msrb.mxu2 %v3908_v35  ;;  %v2796_v46 = vsel %vm2780_vm7, %v2788_v22, %v2795_v24  ;;  %3994 = vmatmul.msk.bf16.vlgmr.msra.gmra.mxu1 %vm1740_vm0, %v4468_v48  ;;  %v4230_v35 = vld [vmem:[#allocation5 + $0x6ec] sm:$0xf]  ;;  %v350_v51 = vperm.slane %v4600_v42, 2  ;;  %v348_v2 = vperm.slane %v4600_v42, 0  ;;  %v349_v3 = vperm.slane %v4600_v42, 1 }
  0xe4   :  { %2463 = vmatpush.bf16.msrb.mxu3 %v3912_v36  ;;  %2437 = vmatpush.bf16.msrb.mxu1 %v3904_v45  ;;  %2896 = vst [vmem:[#allocation8 + $0x8] sm:$0xff] %v2796_v46  ;;  %v3925_v36 = vld [vmem:[#allocation5 + $0x7e8] sm:$0xf0]  ;;  %v352_v50 = vperm.slane %v4600_v42, 4  ;;  %v353_v6 = vperm.slane %v4600_v42, 5  ;;  %v354_v11 = vperm.slane %v4600_v42, 6  ;;  %v3412_v46 = vor.u32 %v4134_v55, %v3411_v13 }
  0xe5   :  { %3996 = vmatmul.msk.bf16.vlgmr.msra.gmra.mxu3 %vm1740_vm0, %v4468_v48  ;;  %v1987_v45 = vpop.f32.mrf.mxu2  ;;  %v351_v48 = vperm.slane %v4600_v42, 3  ;;  %v3928_v54 = vor.u32 %v4230_v35, %v3925_v36  ;;  %v355_v12 = vperm.slane %v4600_v42, 7  ;;  %v4611_v22 = vadd.f32 %v4585_v60, %v348_v2  ;;  %v3147_v36 = vld [vmem:[#allocation5 + $0xe0] sm:$0xf]  ;;  %v3685_v55 = vld [vmem:[#allocation5 + $0x5f8] sm:$0xf0] }
  0xe6   :  { %2425 = vmatpush.bf16.msrb.mxu0 %v3644_v0  ;;  %v1963_v57 = vpop.f32.mrf.mxu0  ;;  %v4165_v0 = vld [vmem:[#allocation5 + $0x4e4] sm:$0xf]  ;;  %v1988_v9 = vadd.f32 %v1987_v45, %v350_v51  ;;  %v1975_v28 = vadd.f32 %v4589_v15, %v349_v3  ;;  %v3416_v35 = vor.u32 %v4102_v18, %v3413_v20  ;;  %v4264_v51 = vld [vmem:[#allocation5 + $0x7f4] sm:$0xf0]  ;;  %v4199_v18 = vld [vmem:[#allocation5 + $0x5ec] sm:$0xf0] }
  0xe7   :  { %2451 = vmatpush.bf16.msrb.mxu2 %v3652_v14  ;;  %v3669_v14 = vld [vmem:[#allocation5 + $0x5e8] sm:$0xf0]  ;;  %v3149_v15 = vld [vmem:[#allocation5 + $0x1e0] sm:$0xf0]  ;;  %v2592_v45 = vmax.f32 %v4611_v22, 0.0  ;;  %v3940_v3 = vor.u32 %v4264_v51, %v3939_v41 }
  0xe8   :  { %2464 = vmatpush.bf16.msrb.mxu3 %v3656_v44  ;;  %2438 = vmatpush.bf16.msrb.mxu1 %v3648_v1  ;;  %v2000_v52 = vpop.f32.mrf.mxu3  ;;  %v3659_v44 = vld [vmem:[#allocation5 + $0x4e0] sm:$0xf]  ;;  %v1976_v62 = vpop.f32.mrf.mxu1  ;;  %v3661_v1 = vld [vmem:[#allocation5 + $0x5e0] sm:$0xf0]  ;;  %v3672_v5 = vor.u32 %v4166_v61, %v3669_v14  ;;  %v2594_v33 = vmax.f32 %v1988_v9, 0.0 }
  0xe9   :  { %v3660_v7 = vor.u32 %v4197_v63, %v3659_v44  ;;  %v3664_v8 = vor.u32 %v4165_v0, %v3661_v1  ;;  %v2001_v10 = vadd.f32 %v2000_v52, %v351_v48  ;;  %v4232_v48 = vld [vmem:[#allocation5 + $0x6fc] sm:$0xf]  ;;  %v2593_v52 = vmax.f32 %v1975_v28, 0.0  ;;  %v4231_v61 = vld [vmem:[#allocation5 + $0x6f4] sm:$0xf] }
  0xea   :  { %2426 = vmatpush.bf16.msrb.mxu0 %v3388_v16  ;;  %v3155_v16 = vld [vmem:[#allocation5 + $0xe8] sm:$0xf]  ;;  %v3933_v14 = vld [vmem:[#allocation5 + $0x7f0] sm:$0xf0]  ;;  %v3148_v63 = vor.u32 %v4069_v37, %v3147_v36  ;;  %v3152_v0 = vor.u32 %v4037_v23, %v3149_v15  ;;  %v3429_v37 = vld [vmem:[#allocation5 + $0x3f8] sm:$0xf0] }
  0xeb   :  { %2452 = vmatpush.bf16.msrb.mxu2 %v3396_v25  ;;  %v4133_v25 = vld [vmem:[#allocation5 + $0x3dc] sm:$0xf0]  ;;  %v2595_v34 = vmax.f32 %v2001_v10, 0.0  ;;  %v3936_v13 = vor.u32 %v4231_v61, %v3933_v14  ;;  %v4103_v23 = vld [vmem:[#allocation5 + $0x2f4] sm:$0xf] }
  0xec   :  { %2465 = vmatpush.bf16.msrb.mxu3 %v3400_v26  ;;  %2439 = vmatpush.bf16.msrb.mxu1 %v3392_v30  ;;  %v4101_v26 = vld [vmem:[#allocation5 + $0x2e4] sm:$0xf]  ;;  %v4070_v30 = vld [vmem:[#allocation5 + $0x1e4] sm:$0xf0]  ;;  %v3421_v15 = vld [vmem:[#allocation5 + $0x3f0] sm:$0xf0] }
  0xed   :  { %v1989_v17 = vpop.f32.mrf.mxu2  ;;  %v3408_v40 = vor.u32 %v4101_v26, %v3405_v27  ;;  %v2649_v56 = vpack.c.bf16 %v2595_v34, %v2594_v33  ;;  %v3156_v57 = vor.u32 %v4070_v30, %v3155_v16  ;;  %v4104_v33 = vld [vmem:[#allocation5 + $0x2fc] sm:$0xf]  ;;  %v3424_v61 = vor.u32 %v4103_v23, %v3421_v15 }
  0xee   :  { %2427 = vmatpush.bf16.msrb.mxu0 %v3132_v47  ;;  %v2013_v29 = vpop.f32.mrf.mxu0  ;;  %v3675_v17 = vld [vmem:[#allocation5 + $0x4f0] sm:$0xf]  ;;  %v3173_v14 = vld [vmem:[#allocation5 + $0x1f8] sm:$0xf0] }
  0xef   :  { %2453 = vmatpush.bf16.msrb.mxu2 %v3140_v38  ;;  %v2014_v60 = vadd.f32 %v2013_v29, %v352_v50  ;;  %v4200_v50 = vld [vmem:[#allocation5 + $0x5f4] sm:$0xf0]  ;;  %v2719_v20 = vrot.slane %v2649_v56, 6  ;;  %v3676_v16 = vor.u32 %v4199_v18, %v3675_v17 }
  0xf0   :  { %2466 = vmatpush.bf16.msrb.mxu3 %v3144_v39  ;;  %2440 = vmatpush.bf16.msrb.mxu1 %v3136_v49  ;;  %v2002_v24 = vpop.f32.mrf.mxu3  ;;  %v2026_v19 = vpop.f32.mrf.mxu1  ;;  %v3404_v39 = vor.u32 %v4133_v25, %v3403_v21  ;;  %v4615_v49 = vld [vmem:[#allocation2] sm:$0x1]  ;;  %v2720_v25 = vrot.slane %v2649_v56, 1  ;;  %v4072_v56 = vld [vmem:[#allocation5 + $0x1f4] sm:$0xf0] }
  0xf1   :  { %v2027_v38 = vadd.f32 %v2026_v19, %v353_v6  ;;  %v2596_v47 = vmax.f32 %v2014_v60, 0.0  ;;  %3997 = vmatmul.msk.bf16.vlgmr.msrb.gmra.mxu0 %vm1740_vm0, %v4615_v49  ;;  %v4168_v6 = vld [vmem:[#allocation5 + $0x4fc] sm:$0xf]  ;;  %v3677_v24 = vld [vmem:[#allocation5 + $0x5f0] sm:$0xf0] }
  0xf2   :  { %2476 = vmatpush.bf16.msra.mxu0 %v3916_v58  ;;  %3999 = vmatmul.msk.bf16.vlgmr.msrb.gmra.mxu2 %vm1740_vm0, %v4615_v49  ;;  %v3160_v58 = vor.u32 %v4038_v31, %v3157_v32  ;;  %v3427_v31 = vld [vmem:[#allocation5 + $0x2f8] sm:$0xf]  ;;  %v2802_v34 = vsel %vm2764_vm1, %v2719_v20, %v2720_v25 }
  0xf3   :  { %2502 = vmatpush.bf16.msra.mxu2 %v3924_v53  ;;  %v2597_v53 = vmax.f32 %v2027_v38, 0.0  ;;  %3998 = vmatmul.msk.bf16.vlgmr.msrb.gmra.mxu1 %vm1740_vm0, %v4615_v49  ;;  %v4136_v32 = vld [vmem:[#allocation5 + $0x3f4] sm:$0xf0]  ;;  %v3419_v38 = vld [vmem:[#allocation5 + $0x2f0] sm:$0xf] }
  0xf4   :  { %2515 = vmatpush.bf16.msra.mxu3 %v3928_v54  ;;  %2489 = vmatpush.bf16.msra.mxu1 %v3920_v59  ;;  %v3941_v54 = vld [vmem:[#allocation5 + $0x7f8] sm:$0xf0]  ;;  %v4263_v59 = vld [vmem:[#allocation5 + $0x7ec] sm:$0xf0] }
  0xf5   :  { %4000 = vmatmul.msk.bf16.vlgmr.msrb.gmra.mxu3 %vm1740_vm0, %v4615_v49  ;;  %v2650_v44 = vpack.c.bf16 %v2597_v53, %v2596_v47  ;;  %v2039_v62 = vpop.f32.mrf.mxu2  ;;  %v3932_v10 = vor.u32 %v4263_v59, %v3931_v43  ;;  %v3428_v53 = vor.u32 %v4136_v32, %v3427_v31  ;;  %v3171_v43 = vld [vmem:[#allocation5 + $0xf8] sm:$0xf] }
  0xf6   :  { %2477 = vmatpush.bf16.msra.mxu0 %v3660_v7  ;;  %v2040_v1 = vadd.f32 %v2039_v62, %v354_v11  ;;  %v2648_v7 = vpack.c.bf16 %v2593_v52, %v2592_v45  ;;  %v2015_v9 = vpop.f32.mrf.mxu0  ;;  %v4167_v11 = vld [vmem:[#allocation5 + $0x4f4] sm:$0xf]  ;;  %v4071_v62 = vld [vmem:[#allocation5 + $0x1ec] sm:$0xf0] }
  0xf7   :  { %2503 = vmatpush.bf16.msra.mxu2 %v3668_v4  ;;  %v3944_v4 = vor.u32 %v4232_v48, %v3941_v54  ;;  %v2721_v26 = vrot.slane %v2650_v44, 4  ;;  %v2722_v27 = vrot.slane %v2650_v44, 7  ;;  %v3680_v30 = vor.u32 %v4167_v11, %v3677_v24  ;;  %v3163_v44 = vld [vmem:[#allocation5 + $0xf0] sm:$0xf] }
  0xf8   :  { %2516 = vmatpush.bf16.msra.mxu3 %v3672_v5  ;;  %2490 = vmatpush.bf16.msra.mxu1 %v3664_v8  ;;  %v2052_v2 = vpop.f32.mrf.mxu3  ;;  %v3683_v5 = vld [vmem:[#allocation5 + $0x4f8] sm:$0xf]  ;;  %v2598_v21 = vmax.f32 %v2040_v1, 0.0  ;;  %v2028_v22 = vpop.f32.mrf.mxu1  ;;  %v2718_v29 = vrot.slane %v2648_v7, 3  ;;  %v3432_v54 = vor.u32 %v4104_v33, %v3429_v37  ;;  %v3172_v1 = vor.u32 %v4072_v56, %v3171_v43 }
  0xf9   :  { %v2053_v8 = vadd.f32 %v2052_v2, %v355_v12  ;;  %v3684_v42 = vor.u32 %v4200_v50, %v3683_v5  ;;  %v3688_v12 = vor.u32 %v4168_v6, %v3685_v55  ;;  %v2806_v60 = vsel %vm2770_vm2, %v2721_v26, %v2722_v27  ;;  %v319_v6 = vld [vmem:[#allocation7 + $0x18] sm:$0xff] }
  0xfa   :  { %2478 = vmatpush.bf16.msra.mxu0 %v3404_v39  ;;  %v2799_v41 = vsel %vm2760_vm3, %v2648_v7, %v2718_v29  ;;  %v359_v9 = vperm.slane %v319_v6, 3  ;;  %v357_v55 = vperm.slane %v319_v6, 1  ;;  %v360_v20 = vperm.slane %v319_v6, 4 }
  0xfb   :  { %2504 = vmatpush.bf16.msra.mxu2 %v3412_v46  ;;  %v2599_v28 = vmax.f32 %v2053_v8, 0.0  ;;  %v2803_v51 = vsel %vm2768_vm4, %v2799_v41, %v2802_v34  ;;  %v358_v8 = vperm.slane %v319_v6, 2  ;;  %v361_v22 = vperm.slane %v319_v6, 5 }
  0xfc   :  { %2517 = vmatpush.bf16.msra.mxu3 %v3416_v35  ;;  %2491 = vmatpush.bf16.msra.mxu1 %v3408_v40  ;;  %v4135_v40 = vld [vmem:[#allocation5 + $0x3ec] sm:$0xf0]  ;;  %v363_v33 = vperm.slane %v319_v6, 7 }
  0xfd   :  { %v2651_v46 = vpack.c.bf16 %v2599_v28, %v2598_v21  ;;  %v2041_v36 = vpop.f32.mrf.mxu2  ;;  %v3420_v59 = vor.u32 %v4135_v40, %v3419_v38 }
  0xfe   :  { %2479 = vmatpush.bf16.msra.mxu0 %v3148_v63  ;;  %v2065_v47 = vpop.f32.mrf.mxu0  ;;  %v4039_v63 = vld [vmem:[#allocation5 + $0xf4] sm:$0xf] }
  0xff   :  { %2505 = vmatpush.bf16.msra.mxu2 %v3156_v57  ;;  %v2723_v19 = vrot.slane %v2651_v46, 2  ;;  %v2724_v35 = vrot.slane %v2651_v46, 5  ;;  %v4040_v57 = vld [vmem:[#allocation5 + $0xfc] sm:$0xf] }
 0x100   :  { %2518 = vmatpush.bf16.msra.mxu3 %v3160_v58  ;;  %2492 = vmatpush.bf16.msra.mxu1 %v3152_v0  ;;  %v2054_v39 = vpop.f32.mrf.mxu3  ;;  %v2078_v52 = vpop.f32.mrf.mxu1  ;;  %v3165_v0 = vld [vmem:[#allocation5 + $0x1f0] sm:$0xf0]  ;;  %v3176_v2 = vor.u32 %v4040_v57, %v3173_v14 }
 0x101   :  { %v2809_v45 = vsel %vm2774_vm5, %v2723_v19, %v2724_v35  ;;  %4001 = vmatmul.msk.bf16.vlgmr.msra.gmra.mxu0 %vm1740_vm0, %v4615_v49  ;;  %v3168_v5 = vor.u32 %v4039_v63, %v3165_v0  ;;  %v2079_v25 = vadd.f32 %v2078_v52, %v357_v55 }
 0x102   :  { %2528 = vmatpush.bf16.msrb.mxu0 %v3932_v10  ;;  %v2810_v48 = vsel %vm2778_vm6, %v2806_v60, %v2809_v45  ;;  %4003 = vmatmul.msk.bf16.vlgmr.msra.gmra.mxu2 %vm1740_vm0, %v4615_v49 }
 0x103   :  { %2554 = vmatpush.bf16.msrb.mxu2 %v3940_v3  ;;  %v2811_v58 = vsel %vm2780_vm7, %v2803_v51, %v2810_v48  ;;  %4002 = vmatmul.msk.bf16.vlgmr.msra.gmra.mxu1 %vm1740_vm0, %v4615_v49  ;;  %v2601_v31 = vmax.f32 %v2079_v25, 0.0 }
 0x104   :  { %2567 = vmatpush.bf16.msrb.mxu3 %v3944_v4  ;;  %2541 = vmatpush.bf16.msrb.mxu1 %v3936_v13  ;;  %2897 = vst [vmem:[#allocation8 + $0x10] sm:$0xff] %v2811_v58  ;;  %v3164_v4 = vor.u32 %v4071_v62, %v3163_v44  ;;  %v356_v13 = vperm.slane %v319_v6, 0 }
 0x105   :  { %4004 = vmatmul.msk.bf16.vlgmr.msra.gmra.mxu3 %vm1740_vm0, %v4615_v49  ;;  %v2091_v3 = vpop.f32.mrf.mxu2 }
 0x106   :  { %2529 = vmatpush.bf16.msrb.mxu0 %v3676_v16  ;;  %v2067_v7 = vpop.f32.mrf.mxu0  ;;  %v2092_v17 = vadd.f32 %v2091_v3, %v358_v8  ;;  %v2066_v24 = vadd.f32 %v2065_v47, %v356_v13  ;;  %v362_v16 = vperm.slane %v319_v6, 6 }
 0x107   :  { %2555 = vmatpush.bf16.msrb.mxu2 %v3684_v42 }
 0x108   :  { %2568 = vmatpush.bf16.msrb.mxu3 %v3688_v12  ;;  %2542 = vmatpush.bf16.msrb.mxu1 %v3680_v30  ;;  %v2104_v50 = vpop.f32.mrf.mxu3  ;;  %v2080_v10 = vpop.f32.mrf.mxu1  ;;  %v2602_v27 = vmax.f32 %v2092_v17, 0.0  ;;  %v2600_v30 = vmax.f32 %v2066_v24, 0.0 }
 0x109   :  { %v2105_v18 = vadd.f32 %v2104_v50, %v359_v9 }
 0x10a   :  { %2530 = vmatpush.bf16.msrb.mxu0 %v3420_v59  ;;  %v2652_v37 = vpack.c.bf16 %v2601_v31, %v2600_v30 }
 0x10b   :  { %2556 = vmatpush.bf16.msrb.mxu2 %v3428_v53  ;;  %v2603_v28 = vmax.f32 %v2105_v18, 0.0 }
 0x10c   :  { %2569 = vmatpush.bf16.msrb.mxu3 %v3432_v54  ;;  %2543 = vmatpush.bf16.msrb.mxu1 %v3424_v61  ;;  %v2725_v48 = vrot.slane %v2652_v37, 3 }
 0x10d   :  { %v2093_v21 = vpop.f32.mrf.mxu2  ;;  %v2653_v34 = vpack.c.bf16 %v2603_v28, %v2602_v27 }
 0x10e   :  { %2531 = vmatpush.bf16.msrb.mxu0 %v3164_v4  ;;  %v2117_v26 = vpop.f32.mrf.mxu0  ;;  %v2814_v58 = vsel %vm2760_vm3, %v2652_v37, %v2725_v48 }
 0x10f   :  { %2557 = vmatpush.bf16.msrb.mxu2 %v3172_v1  ;;  %v2118_v42 = vadd.f32 %v2117_v26, %v360_v20  ;;  %v2726_v40 = vrot.slane %v2653_v34, 6  ;;  %v2727_v41 = vrot.slane %v2653_v34, 1 }
 0x110   :  { %2570 = vmatpush.bf16.msrb.mxu3 %v3176_v2  ;;  %2544 = vmatpush.bf16.msrb.mxu1 %v3168_v5  ;;  %v2106_v11 = vpop.f32.mrf.mxu3  ;;  %v2130_v12 = vpop.f32.mrf.mxu1  ;;  %v320_v2 = vld [vmem:[#allocation7 + $0x20] sm:$0xff] }
 0x111   :  { %v2131_v29 = vadd.f32 %v2130_v12, %v361_v22  ;;  %v2604_v46 = vmax.f32 %v2118_v42, 0.0  ;;  %4005 = vmatmul.msk.bf16.vlgmr.msrb.gmra.mxu0 %vm1740_vm0, %v4615_v49  ;;  %v366_v4 = vperm.slane %v320_v2, 2  ;;  %v367_v5 = vperm.slane %v320_v2, 3 }
 0x112   :  { %4007 = vmatmul.msk.bf16.vlgmr.msrb.gmra.mxu2 %vm1740_vm0, %v4615_v49  ;;  %v364_v6 = vperm.slane %v320_v2, 0  ;;  %v365_v7 = vperm.slane %v320_v2, 1  ;;  %v368_v10 = vperm.slane %v320_v2, 4  ;;  %v369_v55 = vperm.slane %v320_v2, 5 }
 0x113   :  { %v2605_v32 = vmax.f32 %v2131_v29, 0.0  ;;  %4006 = vmatmul.msk.bf16.vlgmr.msrb.gmra.mxu1 %vm1740_vm0, %v4615_v49  ;;  %v370_v28 = vperm.slane %v320_v2, 6 }
 0x115   :  { %4008 = vmatmul.msk.bf16.vlgmr.msrb.gmra.mxu3 %vm1740_vm0, %v4615_v49  ;;  %v2654_v60 = vpack.c.bf16 %v2605_v32, %v2604_v46  ;;  %v2143_v19 = vpop.f32.mrf.mxu2  ;;  %v2817_v49 = vsel %vm2764_vm1, %v2726_v40, %v2727_v41  ;;  %v371_v46 = vperm.slane %v320_v2, 7 }
 0x116   :  { %v2144_v35 = vadd.f32 %v2143_v19, %v362_v16  ;;  %v2119_v39 = vpop.f32.mrf.mxu0  ;;  %v2818_v14 = vsel %vm2768_vm4, %v2814_v58, %v2817_v49 }
 0x117   :  { %v2728_v45 = vrot.slane %v2654_v60, 4  ;;  %v2729_v47 = vrot.slane %v2654_v60, 7 }
 0x118   :  { %v2156_v36 = vpop.f32.mrf.mxu3  ;;  %v2606_v23 = vmax.f32 %v2144_v35, 0.0  ;;  %v2132_v15 = vpop.f32.mrf.mxu1 }
 0x119   :  { %v2157_v38 = vadd.f32 %v2156_v36, %v363_v33  ;;  %v2821_v53 = vsel %vm2770_vm2, %v2728_v45, %v2729_v47 }
 0x11b   :  { %v2607_v51 = vmax.f32 %v2157_v38, 0.0 }
 0x11d   :  { %v2655_v52 = vpack.c.bf16 %v2607_v51, %v2606_v23  ;;  %v2145_v56 = vpop.f32.mrf.mxu2 }
 0x11e   :  { %v2169_v61 = vpop.f32.mrf.mxu0 }
 0x11f   :  { %v2730_v54 = vrot.slane %v2655_v52, 2  ;;  %v2731_v43 = vrot.slane %v2655_v52, 5  ;;  %v2170_v18 = vadd.f32 %v2169_v61, %v364_v6 }
 0x120   :  { %v2158_v57 = vpop.f32.mrf.mxu3  ;;  %v2182_v62 = vpop.f32.mrf.mxu1 }
 0x121   :  { %v2824_v59 = vsel %vm2774_vm5, %v2730_v54, %v2731_v43  ;;  %v2183_v20 = vadd.f32 %v2182_v62, %v365_v7  ;;  %v2608_v42 = vmax.f32 %v2170_v18, 0.0 }
 0x122   :  { %v2825_v44 = vsel %vm2778_vm6, %v2821_v53, %v2824_v59 }
 0x123   :  { %v2826_v63 = vsel %vm2780_vm7, %v2818_v14, %v2825_v44  ;;  %v2609_v12 = vmax.f32 %v2183_v20, 0.0  ;;  %v321_v44 = vld [vmem:[#allocation7 + $0x28] sm:$0xff] }
 0x124   :  { %2898 = vst [vmem:[#allocation8 + $0x18] sm:$0xff] %v2826_v63  ;;  %v374_v63 = vperm.slane %v321_v44, 2  ;;  %v372_v2 = vperm.slane %v321_v44, 0  ;;  %v377_v7 = vperm.slane %v321_v44, 5 }
 0x125   :  { %v2195_v0 = vpop.f32.mrf.mxu2  ;;  %v2656_v34 = vpack.c.bf16 %v2609_v12, %v2608_v42 }
 0x126   :  { %v2171_v3 = vpop.f32.mrf.mxu0  ;;  %v2196_v8 = vadd.f32 %v2195_v0, %v366_v4  ;;  %v375_v0 = vperm.slane %v321_v44, 3 }
 0x127   :  { %v2732_v15 = vrot.slane %v2656_v34, 3  ;;  %v373_v3 = vperm.slane %v321_v44, 1 }
 0x128   :  { %v2208_v1 = vpop.f32.mrf.mxu3  ;;  %v2184_v50 = vpop.f32.mrf.mxu1  ;;  %v2610_v22 = vmax.f32 %v2196_v8, 0.0 }
 0x129   :  { %v2209_v9 = vadd.f32 %v2208_v1, %v367_v5  ;;  %v2829_v53 = vsel %vm2760_vm3, %v2656_v34, %v2732_v15  ;;  %v376_v50 = vperm.slane %v321_v44, 4 }
 0x12b   :  { %v2611_v11 = vmax.f32 %v2209_v9, 0.0 }
 0x12d   :  { %v2197_v13 = vpop.f32.mrf.mxu2  ;;  %v2657_v16 = vpack.c.bf16 %v2611_v11, %v2610_v22  ;;  %v378_v11 = vperm.slane %v321_v44, 6 }
 0x12e   :  { %v2221_v21 = vpop.f32.mrf.mxu0 }
 0x12f   :  { %v2222_v24 = vadd.f32 %v2221_v21, %v368_v10  ;;  %v2733_v35 = vrot.slane %v2657_v16, 6  ;;  %v2734_v38 = vrot.slane %v2657_v16, 1 }
 0x130   :  { %v2210_v17 = vpop.f32.mrf.mxu3  ;;  %v2234_v25 = vpop.f32.mrf.mxu1 }
 0x131   :  { %v2235_v26 = vadd.f32 %v2234_v25, %v369_v55  ;;  %v2612_v27 = vmax.f32 %v2222_v24, 0.0  ;;  %v2832_v45 = vsel %vm2764_vm1, %v2733_v35, %v2734_v38 }
 0x132   :  { %v2833_v56 = vsel %vm2768_vm4, %v2829_v53, %v2832_v45 }
 0x133   :  { %v2613_v29 = vmax.f32 %v2235_v26, 0.0 }
 0x135   :  { %v2658_v30 = vpack.c.bf16 %v2613_v29, %v2612_v27  ;;  %v2247_v31 = vpop.f32.mrf.mxu2  ;;  %v379_v27 = vperm.slane %v321_v44, 7 }
 0x136   :  { %v2248_v32 = vadd.f32 %v2247_v31, %v370_v28  ;;  %v2223_v19 = vpop.f32.mrf.mxu0 }
 0x137   :  { %v2735_v39 = vrot.slane %v2658_v30, 4  ;;  %v2736_v40 = vrot.slane %v2658_v30, 7 }
 0x138   :  { %v2260_v33 = vpop.f32.mrf.mxu3  ;;  %v2614_v36 = vmax.f32 %v2248_v32, 0.0  ;;  %v2236_v37 = vpop.f32.mrf.mxu1 }
 0x139   :  { %v2261_v60 = vadd.f32 %v2260_v33, %v371_v46  ;;  %v2836_v47 = vsel %vm2770_vm2, %v2735_v39, %v2736_v40 }
 0x13b   :  { %v2615_v23 = vmax.f32 %v2261_v60, 0.0 }
 0x13d   :  { %v2659_v41 = vpack.c.bf16 %v2615_v23, %v2614_v36  ;;  %v2249_v52 = vpop.f32.mrf.mxu2 }
 0x13e   :  { %v2273_v43 = vpop.f32.mrf.mxu0 }
 0x13f   :  { %v2737_v51 = vrot.slane %v2659_v41, 2  ;;  %v2738_v48 = vrot.slane %v2659_v41, 5  ;;  %v2274_v9 = vadd.f32 %v2273_v43, %v372_v2 }
 0x140   :  { %v2262_v49 = vpop.f32.mrf.mxu3  ;;  %v2286_v58 = vpop.f32.mrf.mxu1 }
 0x141   :  { %v2839_v54 = vsel %vm2774_vm5, %v2737_v51, %v2738_v48  ;;  %v2287_v10 = vadd.f32 %v2286_v58, %v373_v3  ;;  %v2616_v24 = vmax.f32 %v2274_v9, 0.0 }
 0x142   :  { %v2840_v57 = vsel %vm2778_vm6, %v2836_v47, %v2839_v54 }
 0x143   :  { %v2841_v59 = vsel %vm2780_vm7, %v2833_v56, %v2840_v57  ;;  %v2617_v25 = vmax.f32 %v2287_v10, 0.0  ;;  %v322_v57 = vld [vmem:[#allocation7 + $0x30] sm:$0xff] }
 0x144   :  { %2899 = vst [vmem:[#allocation8 + $0x20] sm:$0xff] %v2841_v59  ;;  %v382_v59 = vperm.slane %v322_v57, 2  ;;  %v380_v44 = vperm.slane %v322_v57, 0  ;;  %v385_v3 = vperm.slane %v322_v57, 5 }
 0x145   :  { %v2299_v61 = vpop.f32.mrf.mxu2  ;;  %v2660_v16 = vpack.c.bf16 %v2617_v25, %v2616_v24 }
 0x146   :  { %v2275_v62 = vpop.f32.mrf.mxu0  ;;  %v2300_v4 = vadd.f32 %v2299_v61, %v374_v63  ;;  %v383_v61 = vperm.slane %v322_v57, 3 }
 0x147   :  { %v2739_v37 = vrot.slane %v2660_v16, 3  ;;  %v381_v62 = vperm.slane %v322_v57, 1 }
 0x148   :  { %v2312_v14 = vpop.f32.mrf.mxu3  ;;  %v2288_v1 = vpop.f32.mrf.mxu1  ;;  %v2618_v55 = vmax.f32 %v2300_v4, 0.0 }
 0x149   :  { %v2313_v5 = vadd.f32 %v2312_v14, %v375_v0  ;;  %v2844_v47 = vsel %vm2760_vm3, %v2660_v16, %v2739_v37  ;;  %v384_v1 = vperm.slane %v322_v57, 4 }
 0x14b   :  { %v2619_v17 = vmax.f32 %v2313_v5, 0.0 }
 0x14d   :  { %v2301_v6 = vpop.f32.mrf.mxu2  ;;  %v2661_v28 = vpack.c.bf16 %v2619_v17, %v2618_v55  ;;  %v386_v17 = vperm.slane %v322_v57, 6 }
 0x14e   :  { %v2325_v13 = vpop.f32.mrf.mxu0 }
 0x14f   :  { %v2326_v18 = vadd.f32 %v2325_v13, %v376_v50  ;;  %v2740_v32 = vrot.slane %v2661_v28, 6  ;;  %v2741_v60 = vrot.slane %v2661_v28, 1 }
 0x150   :  { %v2314_v8 = vpop.f32.mrf.mxu3  ;;  %v2338_v20 = vpop.f32.mrf.mxu1 }
 0x151   :  { %v2339_v21 = vadd.f32 %v2338_v20, %v377_v7  ;;  %v2620_v22 = vmax.f32 %v2326_v18, 0.0  ;;  %v2847_v39 = vsel %vm2764_vm1, %v2740_v32, %v2741_v60 }
 0x152   :  { %v2848_v52 = vsel %vm2768_vm4, %v2844_v47, %v2847_v39 }
 0x153   :  { %v2621_v26 = vmax.f32 %v2339_v21, 0.0 }
 0x155   :  { %v2662_v42 = vpack.c.bf16 %v2621_v26, %v2620_v22  ;;  %v2351_v12 = vpop.f32.mrf.mxu2  ;;  %v387_v22 = vperm.slane %v322_v57, 7 }
 0x156   :  { %v2352_v29 = vadd.f32 %v2351_v12, %v378_v11  ;;  %v2327_v31 = vpop.f32.mrf.mxu0 }
 0x157   :  { %v2742_v19 = vrot.slane %v2662_v42, 4  ;;  %v2743_v35 = vrot.slane %v2662_v42, 7 }
 0x158   :  { %v2364_v46 = vpop.f32.mrf.mxu3  ;;  %v2622_v33 = vmax.f32 %v2352_v29, 0.0  ;;  %v2340_v34 = vpop.f32.mrf.mxu1 }
 0x159   :  { %v2365_v30 = vadd.f32 %v2364_v46, %v379_v27  ;;  %v2851_v40 = vsel %vm2770_vm2, %v2742_v19, %v2743_v35 }
 0x15b   :  { %v2623_v36 = vmax.f32 %v2365_v30, 0.0 }
 0x15d   :  { %v2663_v38 = vpack.c.bf16 %v2623_v36, %v2622_v33  ;;  %v2353_v41 = vpop.f32.mrf.mxu2 }
 0x15e   :  { %v2377_v48 = vpop.f32.mrf.mxu0 }
 0x15f   :  { %v2744_v23 = vrot.slane %v2663_v38, 2  ;;  %v2745_v15 = vrot.slane %v2663_v38, 5  ;;  %v2378_v5 = vadd.f32 %v2377_v48, %v380_v44 }
 0x160   :  { %v2366_v45 = vpop.f32.mrf.mxu3  ;;  %v2390_v53 = vpop.f32.mrf.mxu1 }
 0x161   :  { %v2854_v51 = vsel %vm2774_vm5, %v2744_v23, %v2745_v15  ;;  %v2391_v50 = vadd.f32 %v2390_v53, %v381_v62  ;;  %v2624_v18 = vmax.f32 %v2378_v5, 0.0 }
 0x162   :  { %v2855_v49 = vsel %vm2778_vm6, %v2851_v40, %v2854_v51 }
 0x163   :  { %v2856_v54 = vsel %vm2780_vm7, %v2848_v52, %v2855_v49  ;;  %v2625_v20 = vmax.f32 %v2391_v50, 0.0  ;;  %v323_v49 = vld [vmem:[#allocation7 + $0x38] sm:$0xff] }
 0x164   :  { %2900 = vst [vmem:[#allocation8 + $0x28] sm:$0xff] %v2856_v54  ;;  %v390_v54 = vperm.slane %v323_v49, 2  ;;  %v388_v57 = vperm.slane %v323_v49, 0  ;;  %v393_v62 = vperm.slane %v323_v49, 5 }
 0x165   :  { %v2403_v43 = vpop.f32.mrf.mxu2  ;;  %v2664_v28 = vpack.c.bf16 %v2625_v20, %v2624_v18 }
 0x166   :  { %v2379_v58 = vpop.f32.mrf.mxu0  ;;  %v2404_v63 = vadd.f32 %v2403_v43, %v382_v59  ;;  %v391_v43 = vperm.slane %v323_v49, 3 }
 0x167   :  { %v2746_v34 = vrot.slane %v2664_v28, 3  ;;  %v389_v58 = vperm.slane %v323_v49, 1 }
 0x168   :  { %v2416_v56 = vpop.f32.mrf.mxu3  ;;  %v2392_v14 = vpop.f32.mrf.mxu1  ;;  %v2626_v7 = vmax.f32 %v2404_v63, 0.0 }
 0x169   :  { %v2417_v0 = vadd.f32 %v2416_v56, %v383_v61  ;;  %v2859_v40 = vsel %vm2760_vm3, %v2664_v28, %v2746_v34  ;;  %v392_v14 = vperm.slane %v323_v49, 4 }
 0x16b   :  { %v2627_v8 = vmax.f32 %v2417_v0, 0.0 }
 0x16d   :  { %v2405_v2 = vpop.f32.mrf.mxu2  ;;  %v2665_v11 = vpack.c.bf16 %v2627_v8, %v2626_v7  ;;  %v394_v8 = vperm.slane %v323_v49, 6 }
 0x16e   :  { %v2429_v6 = vpop.f32.mrf.mxu0 }
 0x16f   :  { %v2430_v9 = vadd.f32 %v2429_v6, %v384_v1  ;;  %v2747_v29 = vrot.slane %v2665_v11, 6  ;;  %v2748_v30 = vrot.slane %v2665_v11, 1 }
 0x170   :  { %v2418_v4 = vpop.f32.mrf.mxu3  ;;  %v2442_v10 = vpop.f32.mrf.mxu1 }
 0x171   :  { %v2443_v13 = vadd.f32 %v2442_v10, %v385_v3  ;;  %v2628_v55 = vmax.f32 %v2430_v9, 0.0  ;;  %v2862_v19 = vsel %vm2764_vm1, %v2747_v29, %v2748_v30 }
 0x172   :  { %v2863_v41 = vsel %vm2768_vm4, %v2859_v40, %v2862_v19 }
 0x173   :  { %v2629_v21 = vmax.f32 %v2443_v13, 0.0 }
 0x175   :  { %v2666_v24 = vpack.c.bf16 %v2629_v21, %v2628_v55  ;;  %v2455_v25 = vpop.f32.mrf.mxu2  ;;  %v395_v55 = vperm.slane %v323_v49, 7 }
 0x176   :  { %v2456_v26 = vadd.f32 %v2455_v25, %v386_v17  ;;  %v2431_v12 = vpop.f32.mrf.mxu0 }
 0x177   :  { %v2749_v31 = vrot.slane %v2666_v24, 4  ;;  %v2750_v32 = vrot.slane %v2666_v24, 7 }
 0x178   :  { %v2468_v27 = vpop.f32.mrf.mxu3  ;;  %v2630_v46 = vmax.f32 %v2456_v26, 0.0  ;;  %v2444_v16 = vpop.f32.mrf.mxu1 }
 0x179   :  { %v2469_v42 = vadd.f32 %v2468_v27, %v387_v22  ;;  %v2866_v35 = vsel %vm2770_vm2, %v2749_v31, %v2750_v32 }
 0x17b   :  { %v2631_v33 = vmax.f32 %v2469_v42, 0.0 }
 0x17d   :  { %v2667_v60 = vpack.c.bf16 %v2631_v33, %v2630_v46  ;;  %v2457_v38 = vpop.f32.mrf.mxu2 }
 0x17e   :  { %v2481_v15 = vpop.f32.mrf.mxu0 }
 0x17f   :  { %v2751_v36 = vrot.slane %v2667_v60, 2  ;;  %v2752_v37 = vrot.slane %v2667_v60, 5  ;;  %v2482_v0 = vadd.f32 %v2481_v15, %v388_v57 }
 0x180   :  { %v2470_v39 = vpop.f32.mrf.mxu3  ;;  %v2494_v47 = vpop.f32.mrf.mxu1 }
 0x181   :  { %v2869_v23 = vsel %vm2774_vm5, %v2751_v36, %v2752_v37  ;;  %v2495_v1 = vadd.f32 %v2494_v47, %v389_v58  ;;  %v2632_v9 = vmax.f32 %v2482_v0, 0.0 }
 0x182   :  { %v2870_v45 = vsel %vm2778_vm6, %v2866_v35, %v2869_v23 }
 0x183   :  { %v2871_v51 = vsel %vm2780_vm7, %v2863_v41, %v2870_v45  ;;  %v2633_v10 = vmax.f32 %v2495_v1, 0.0 }
 0x184   :  { %2901 = vst [vmem:[#allocation8 + $0x30] sm:$0xff] %v2871_v51 }
 0x185   :  { %v2507_v48 = vpop.f32.mrf.mxu2  ;;  %v2668_v11 = vpack.c.bf16 %v2633_v10, %v2632_v9 }
 0x186   :  { %v2483_v53 = vpop.f32.mrf.mxu0  ;;  %v2508_v59 = vadd.f32 %v2507_v48, %v390_v54 }
 0x187   :  { %v2753_v16 = vrot.slane %v2668_v11, 3 }
 0x188   :  { %v2520_v52 = vpop.f32.mrf.mxu3  ;;  %v2496_v56 = vpop.f32.mrf.mxu1  ;;  %v2634_v3 = vmax.f32 %v2508_v59, 0.0 }
 0x189   :  { %v2521_v61 = vadd.f32 %v2520_v52, %v391_v43  ;;  %v2874_v35 = vsel %vm2760_vm3, %v2668_v11, %v2753_v16 }
 0x18b   :  { %v2635_v4 = vmax.f32 %v2521_v61, 0.0 }
 0x18d   :  { %v2509_v44 = vpop.f32.mrf.mxu2  ;;  %v2669_v17 = vpack.c.bf16 %v2635_v4, %v2634_v3 }
 0x18e   :  { %v2533_v2 = vpop.f32.mrf.mxu0 }
 0x18f   :  { %v2534_v5 = vadd.f32 %v2533_v2, %v392_v14  ;;  %v2754_v26 = vrot.slane %v2669_v17, 6  ;;  %v2755_v42 = vrot.slane %v2669_v17, 1 }
 0x190   :  { %v2522_v63 = vpop.f32.mrf.mxu3  ;;  %v2546_v50 = vpop.f32.mrf.mxu1 }
 0x191   :  { %v2547_v6 = vadd.f32 %v2546_v50, %v393_v62  ;;  %v2636_v7 = vmax.f32 %v2534_v5, 0.0  ;;  %v2877_v31 = vsel %vm2764_vm1, %v2754_v26, %v2755_v42 }
 0x192   :  { %v2878_v37 = vsel %vm2768_vm4, %v2874_v35, %v2877_v31 }
 0x193   :  { %v2637_v13 = vmax.f32 %v2547_v6, 0.0 }
 0x195   :  { %v2670_v18 = vpack.c.bf16 %v2637_v13, %v2636_v7  ;;  %v2559_v20 = vpop.f32.mrf.mxu2 }
 0x196   :  { %v2560_v21 = vadd.f32 %v2559_v20, %v394_v8  ;;  %v2535_v25 = vpop.f32.mrf.mxu0 }
 0x197   :  { %v2756_v12 = vrot.slane %v2670_v18, 4  ;;  %v2757_v29 = vrot.slane %v2670_v18, 7 }
 0x198   :  { %v2572_v22 = vpop.f32.mrf.mxu3  ;;  %v2638_v27 = vmax.f32 %v2560_v21, 0.0  ;;  %v2548_v28 = vpop.f32.mrf.mxu1 }
 0x199   :  { %v2573_v24 = vadd.f32 %v2572_v22, %v395_v55  ;;  %v2881_v32 = vsel %vm2770_vm2, %v2756_v12, %v2757_v29 }
 0x19b   :  { %v2639_v46 = vmax.f32 %v2573_v24, 0.0 }
 0x19d   :  { %v2671_v30 = vpack.c.bf16 %v2639_v46, %v2638_v27  ;;  %v2561_v60 = vpop.f32.mrf.mxu2 }
 0x19f   :  { %v2758_v33 = vrot.slane %v2671_v30, 2  ;;  %v2759_v34 = vrot.slane %v2671_v30, 5 }
 0x1a0   :  { %v2574_v19 = vpop.f32.mrf.mxu3 }
 0x1a1   :  { %v2884_v36 = vsel %vm2774_vm5, %v2758_v33, %v2759_v34 }
 0x1a2   :  { %v2885_v38 = vsel %vm2778_vm6, %v2881_v32, %v2884_v36 }
 0x1a3   :  { %v2886_v39 = vsel %vm2780_vm7, %v2878_v37, %v2885_v38 }
 0x1a4   :  { %2902 = vst [vmem:[#allocation8 + $0x38] sm:$0xff] %v2886_v39 }
 0x1a5   :  { %2913 = dma.vmem_to_hbm [thread:$0]  %s2909_s2, 1024, %s2911_s30, [#allocation4]  }
 0x1a6   :  { %4373 = dma.done.wait [#allocation4], 1024  }
 0x1a7   :  { %4374 = vsyncadd [#allocation4], 4294966272 }
 0x1a8   :  { %2918 = vsyncpa [#allocation3], 1 }
 0x1a9   :  { %2919 = vsyncpa [#allocation6], 1 }
 0x1aa   :  { %2920 = vsyncpa [#allocation4], 1 }

</bundles_post_ra>
